<compile_context>
chip_gen: v7x
topology: tpu7x:2x2x1
jax: 0.10.0
libtpu: 0.0.40
codegen_flags: <defaults>
</compile_context>

<pallas_src>
import numpy as np
import jax
import jax.numpy as jnp
from jax import lax
from jax.experimental import pallas as pl
from jax.experimental.pallas import tpu as pltpu

_LANE = 128


def _make_gram_kernel(n_batch, n_ch, tile_rows, n_valid, needs_mask):
    """Build the Gram-accumulation kernel for fixed (static) tiling parameters."""
    pairs = [(c, k) for c in range(n_ch) for k in range(c, n_ch)]  # unique entries

    def kernel(x_ref, y_ref, gx_ref, gy_ref, accx_ref, accy_ref):
        # x_ref, y_ref : (n_batch, n_ch, tile_rows, 128) logit tiles (native dtype)
        # gx_ref/gy_ref: (n_batch, n_pairs) outputs, written once on the last step
        # accx_ref/accy_ref: (n_batch, n_pairs, 128) f32 VMEM partial-sum scratch
        step = pl.program_id(0)

        @pl.when(step == 0)
        def _init():
            accx_ref[...] = jnp.zeros_like(accx_ref)
            accy_ref[...] = jnp.zeros_like(accy_ref)

        if needs_mask:
            # Zero out voxels past the true volume (array padding / partial tile).
            row = lax.broadcasted_iota(jnp.int32, (tile_rows, _LANE), 0)
            lane = lax.broadcasted_iota(jnp.int32, (tile_rows, _LANE), 1)
            gidx = (step * tile_rows + row) * _LANE + lane
            valid = gidx < n_valid
        else:
            valid = None

        def softmax_planes(ref, b):
            # Channel softmax across n_ch dense (tile_rows, 128) planes, in f32.
            p = [ref[b, c].astype(jnp.float32) for c in range(n_ch)]
            m = p[0]
            for c in range(1, n_ch):
                m = jnp.maximum(m, p[c])
            e = [jnp.exp(t - m) for t in p]
            s = e[0]
            for c in range(1, n_ch):
                s = s + e[c]
            r = pl.reciprocal(s, approx=True)   # EUP slot
            r = r * (2.0 - s * r)               # one Newton step -> ~f32-exact
            out = [ei * r for ei in e]
            if valid is not None:
                out = [jnp.where(valid, o, 0.0) for o in out]
            return out

        def accumulate(planes, acc_ref, b):
            # 6 unique Gram entries: dense plane products + sublane partial sums.
            for pi, (c, k) in enumerate(pairs):
                part = jnp.sum(planes[c] * planes[k], axis=0)   # (128,) lane vector
                acc_ref[b, pi, :] += part

        for b in range(n_batch):
            accumulate(softmax_planes(x_ref, b), accx_ref, b)
            accumulate(softmax_planes(y_ref, b), accy_ref, b)

        @pl.when(step == pl.num_programs(0) - 1)
        def _finalize():
            gx_ref[...] = jnp.sum(accx_ref[...], axis=-1)
            gy_ref[...] = jnp.sum(accy_ref[...], axis=-1)

    return kernel


def ca_loss(x, y, *, tile_rows=1024, vmem_limit_bytes=48 * 1024 * 1024):
    """Pallas TPU implementation of CALoss.forward(x, y).

    tile_rows = number of 128-voxel rows per grid step (1024 -> 128K voxels/step,
    ~3-6 MiB of input DMA per step; footprint stays well under v7x's 64 MiB VMEM).
    """
    n_batch, n_ch = x.shape[0], x.shape[1]
    assert n_batch == 2 and n_ch == 3, "CALoss hard-codes reshape(2, 3, S^3)"
    v = int(np.prod(x.shape[2:]))
    assert y.shape[0] == n_batch and y.shape[1] == n_ch
    assert int(np.prod(y.shape[2:])) == v

    # Lay voxels out as dense (rows, 128) planes; keep the native dtype on the wire.
    rows = -(-v // _LANE)
    xf = jnp.reshape(x, (n_batch, n_ch, v))
    yf = jnp.reshape(y, (n_batch, n_ch, v))
    if rows * _LANE != v:  # rare: pad voxel axis up to a lane multiple (masked in-kernel)
        pad = rows * _LANE - v
        xf = jnp.pad(xf, ((0, 0), (0, 0), (0, pad)))
        yf = jnp.pad(yf, ((0, 0), (0, 0), (0, pad)))
    xr = jnp.reshape(xf, (n_batch, n_ch, rows, _LANE))
    yr = jnp.reshape(yf, (n_batch, n_ch, rows, _LANE))

    if rows <= tile_rows:
        t_rows, n_steps = rows, 1                    # small volume: single grid step
    else:
        t_rows = max(8, (tile_rows // 8) * 8)        # multi-step: sublane multiple
        n_steps = -(-rows // t_rows)
    needs_mask = (n_steps * t_rows * _LANE != v)

    kernel = _make_gram_kernel(n_batch, n_ch, t_rows, v, needs_mask)
    n_pairs = (n_ch * (n_ch + 1)) // 2

    gxu, gyu = pl.pallas_call(
        kernel,
        out_shape=(jax.ShapeDtypeStruct((n_batch, n_pairs), jnp.float32),
                   jax.ShapeDtypeStruct((n_batch, n_pairs), jnp.float32)),
        grid_spec=pltpu.PrefetchScalarGridSpec(
            num_scalar_prefetch=0,
            grid=(n_steps,),
            in_specs=[pl.BlockSpec((n_batch, n_ch, t_rows, _LANE),
                                   lambda s: (0, 0, s, 0)),
                      pl.BlockSpec((n_batch, n_ch, t_rows, _LANE),
                                   lambda s: (0, 0, s, 0))],
            out_specs=(pl.BlockSpec((n_batch, n_pairs), lambda s: (0, 0)),
                       pl.BlockSpec((n_batch, n_pairs), lambda s: (0, 0))),
            scratch_shapes=[pltpu.VMEM((n_batch, n_pairs, _LANE), jnp.float32),
                            pltpu.VMEM((n_batch, n_pairs, _LANE), jnp.float32)]),
        compiler_params=pltpu.CompilerParams(
            dimension_semantics=("arbitrary",),
            vmem_limit_bytes=vmem_limit_bytes),
    )(xr, yr)

    # TODO(synk): on v7x (2 TensorCores) split the voxel axis across cores with a
    # CORE_PARALLEL leading grid axis and add the per-core partial Grams here.

    # Tiny epilogue on 2 x 6 unique Gram entries — plain JAX glue.
    def sym(u):  # (2, 6) upper-triangular entries -> (2, 3, 3) symmetric Gram
        r0 = jnp.stack([u[:, 0], u[:, 1], u[:, 2]], axis=-1)
        r1 = jnp.stack([u[:, 1], u[:, 3], u[:, 4]], axis=-1)
        r2 = jnp.stack([u[:, 2], u[:, 4], u[:, 5]], axis=-1)
        return jnp.stack([r0, r1, r2], axis=-2)

    gx, gy = sym(gxu), sym(gyu)

    eps = 1e-8

    def cos_cols(a, b):  # F.cosine_similarity(a, b, dim=0, eps=1e-8), column-wise
        dot = jnp.sum(a * b, axis=0)
        na = jnp.maximum(jnp.sqrt(jnp.sum(a * a, axis=0)), eps)
        nb = jnp.maximum(jnp.sqrt(jnp.sum(b * b, axis=0)), eps)
        return dot / (na * nb)

    ca = (cos_cols(gx[0], gy[0]) + cos_cols(gx[1], gy[1])) / 2.0
    return -jnp.mean(ca)


def ca_loss_ref(x, y):
    """Pure-JAX reference mirroring the PyTorch forward."""
    n, c = x.shape[0], x.shape[1]
    v = int(np.prod(x.shape[2:]))
    px = jax.nn.softmax(x.reshape(n, c, v).astype(jnp.float32), axis=1)
    py = jax.nn.softmax(y.reshape(n, c, v).astype(jnp.float32), axis=1)
    gx = jnp.einsum("ncv,nkv->nck", px, px, precision=lax.Precision.HIGHEST)
    gy = jnp.einsum("ncv,nkv->nck", py, py, precision=lax.Precision.HIGHEST)
    eps = 1e-8

    def cos_cols(a, b):
        dot = jnp.sum(a * b, axis=0)
        na = jnp.maximum(jnp.sqrt(jnp.sum(a * a, axis=0)), eps)
        nb = jnp.maximum(jnp.sqrt(jnp.sum(b * b, axis=0)), eps)
        return dot / (na * nb)

    ca = (cos_cols(gx[0], gy[0]) + cos_cols(gx[1], gy[1])) / 2.0
    return -jnp.mean(ca)


if __name__ == "__main__":
    key = jax.random.PRNGKey(0)
    kx, ky = jax.random.split(key)
    S = 16  # spatial cube edge; the module assumes D = H = W = S
    x = jax.random.normal(kx, (2, 3, S, S, S), dtype=jnp.float32)  # logits
    y = jax.random.normal(ky, (2, 3, S, S, S), dtype=jnp.float32)  # "target" logits

    ref = ca_loss_ref(x, y)

    # 1) small-volume path: whole voxel axis in a single grid step.
    out = jax.jit(ca_loss)(x, y)
    jax.block_until_ready(out)
    assert jnp.allclose(out, ref, rtol=1e-4, atol=1e-4), (out, ref)

    # 2) multi-step accumulation path (4 voxel-row tiles).
    out_tiled = jax.jit(lambda a, b: ca_loss(a, b, tile_rows=8))(x, y)
    jax.block_until_ready(out_tiled)
    assert jnp.allclose(out_tiled, ref, rtol=1e-4, atol=1e-4), (out_tiled, ref)

    # 3) multi-step path with a partial (in-kernel masked) final tile.
    out_masked = jax.jit(lambda a, b: ca_loss(a, b, tile_rows=24))(x, y)
    jax.block_until_ready(out_masked)
    assert jnp.allclose(out_masked, ref, rtol=1e-4, atol=1e-4), (out_masked, ref)

    # 4) native bf16 logits: half the HBM traffic, f32 math stays in-kernel.
    xb, yb = x.astype(jnp.bfloat16), y.astype(jnp.bfloat16)
    ref_bf = ca_loss_ref(xb, yb)
    out_bf = jax.jit(ca_loss)(xb, yb)
    jax.block_until_ready(out_bf)
    assert jnp.allclose(out_bf, ref_bf, rtol=1e-4, atol=1e-4), (out_bf, ref_bf)

    print("KERNEL_OK")
</pallas_src>

<mosaic_0001>
module attributes {stable_mosaic.version = 11 : i64} {
  func.func @kernel(%arg0: i32, %arg1: memref<2x3x32x128xf32, #tpu.memory_space<vmem>>, %arg2: memref<2x3x32x128xf32, #tpu.memory_space<vmem>>, %arg3: memref<2x6xf32, #tpu.memory_space<vmem>>, %arg4: memref<2x6xf32, #tpu.memory_space<vmem>>, %arg5: memref<2x6x128xf32, #tpu.memory_space<vmem>>, %arg6: memref<2x6x128xf32, #tpu.memory_space<vmem>>) attributes {dimension_semantics = [#tpu.dimension_semantics<arbitrary>], iteration_bounds = array<i64: 1>, scalar_prefetch = 0 : i64, scratch_operands = 2 : i64, tpu.core_type = #tpu.core_type<tc>, window_params = [{transform_indices = @transform_0, window_bounds = array<i64: 2, 3, 32, 128>}, {transform_indices = @transform_1, window_bounds = array<i64: 2, 3, 32, 128>}, {pipeline_mode = #tpu.pipeline_mode<synchronous>, transform_indices = @transform_2, window_bounds = array<i64: 2, 6>}, {pipeline_mode = #tpu.pipeline_mode<synchronous>, transform_indices = @transform_3, window_bounds = array<i64: 2, 6>}]} {
    %c0_i32 = arith.constant 0 : i32
    %0 = arith.cmpi eq, %arg0, %c0_i32 : i32
    %1 = arith.extui %0 : i1 to i32
    %c0_i32_0 = arith.constant 0 : i32
    %2 = arith.cmpi ne, %1, %c0_i32_0 : i32
    scf.if %2 {
      %cst_216 = arith.constant 0.000000e+00 : f32
      %294 = vector.broadcast %cst_216 : f32 to vector<2x6x128xf32>
      %c0_217 = arith.constant 0 : index
      %c0_218 = arith.constant 0 : index
      %c0_219 = arith.constant 0 : index
      %295 = vector.load %arg5[%c0_217, %c0_218, %c0_219] : memref<2x6x128xf32, #tpu.memory_space<vmem>>, vector<2x6x128xf32>
      tpu.vector_store %arg5[%c0_217, %c0_218, %c0_219], %294 {strides = array<i32>} : memref<2x6x128xf32, #tpu.memory_space<vmem>>, vector<2x6x128xf32>,
      %cst_220 = arith.constant 0.000000e+00 : f32
      %296 = vector.broadcast %cst_220 : f32 to vector<2x6x128xf32>
      %c0_221 = arith.constant 0 : index
      %c0_222 = arith.constant 0 : index
      %c0_223 = arith.constant 0 : index
      %297 = vector.load %arg6[%c0_221, %c0_222, %c0_223] : memref<2x6x128xf32, #tpu.memory_space<vmem>>, vector<2x6x128xf32>
      tpu.vector_store %arg6[%c0_221, %c0_222, %c0_223], %296 {strides = array<i32>} : memref<2x6x128xf32, #tpu.memory_space<vmem>>, vector<2x6x128xf32>,
    } else {
    }
    %c0 = arith.constant 0 : index
    %c0_1 = arith.constant 0 : index
    %c0_2 = arith.constant 0 : index
    %c0_3 = arith.constant 0 : index
    %3 = vector.load %arg1[%c0, %c0_1, %c0_2, %c0_3] : memref<2x3x32x128xf32, #tpu.memory_space<vmem>>, vector<1x1x32x128xf32>
    %4 = vector.shape_cast %3 : vector<1x1x32x128xf32> to vector<32x128xf32>
    %c0_4 = arith.constant 0 : index
    %c1 = arith.constant 1 : index
    %c0_5 = arith.constant 0 : index
    %c0_6 = arith.constant 0 : index
    %5 = vector.load %arg1[%c0_4, %c1, %c0_5, %c0_6] : memref<2x3x32x128xf32, #tpu.memory_space<vmem>>, vector<1x1x32x128xf32>
    %6 = vector.shape_cast %5 : vector<1x1x32x128xf32> to vector<32x128xf32>
    %c0_7 = arith.constant 0 : index
    %c2 = arith.constant 2 : index
    %c0_8 = arith.constant 0 : index
    %c0_9 = arith.constant 0 : index
    %7 = vector.load %arg1[%c0_7, %c2, %c0_8, %c0_9] : memref<2x3x32x128xf32, #tpu.memory_space<vmem>>, vector<1x1x32x128xf32>
    %8 = vector.shape_cast %7 : vector<1x1x32x128xf32> to vector<32x128xf32>
    %9 = arith.maximumf %4, %6 : vector<32x128xf32>
    %10 = arith.maximumf %9, %8 : vector<32x128xf32>
    %11 = arith.subf %4, %10 : vector<32x128xf32>
    %12 = math.exp %11 : vector<32x128xf32>
    %13 = arith.subf %6, %10 : vector<32x128xf32>
    %14 = math.exp %13 : vector<32x128xf32>
    %15 = arith.subf %8, %10 : vector<32x128xf32>
    %16 = math.exp %15 : vector<32x128xf32>
    %17 = arith.addf %12, %14 : vector<32x128xf32>
    %18 = arith.addf %17, %16 : vector<32x128xf32>
    %19 = tpu.reciprocal %18 {approx = true} : vector<32x128xf32> -> vector<32x128xf32>
    %20 = arith.mulf %18, %19 : vector<32x128xf32>
    %cst = arith.constant 2.000000e+00 : f32
    %21 = vector.broadcast %cst : f32 to vector<32x128xf32>
    %22 = arith.subf %21, %20 : vector<32x128xf32>
    %23 = arith.mulf %19, %22 : vector<32x128xf32>
    %24 = arith.mulf %12, %23 : vector<32x128xf32>
    %25 = arith.mulf %14, %23 : vector<32x128xf32>
    %26 = arith.mulf %16, %23 : vector<32x128xf32>
    %27 = arith.mulf %24, %24 : vector<32x128xf32>
    %cst_10 = arith.constant dense<0.000000e+00> : vector<128xf32>
    %28 = vector.multi_reduction <add>, %27, %cst_10 [0] : vector<32x128xf32> to vector<128xf32>
    %c0_11 = arith.constant 0 : index
    %c0_12 = arith.constant 0 : index
    %c0_13 = arith.constant 0 : index
    %29 = vector.load %arg5[%c0_11, %c0_12, %c0_13] : memref<2x6x128xf32, #tpu.memory_space<vmem>>, vector<1x1x128xf32>
    %30 = vector.shape_cast %29 : vector<1x1x128xf32> to vector<128xf32>
    %31 = arith.addf %30, %28 : vector<128xf32>
    %c0_14 = arith.constant 0 : index
    %c0_15 = arith.constant 0 : index
    %c0_16 = arith.constant 0 : index
    %32 = vector.load %arg5[%c0_14, %c0_15, %c0_16] : memref<2x6x128xf32, #tpu.memory_space<vmem>>, vector<1x1x128xf32>
    %33 = vector.shape_cast %32 : vector<1x1x128xf32> to vector<128xf32>
    %34 = vector.shape_cast %31 : vector<128xf32> to vector<1x1x128xf32>
    tpu.vector_store %arg5[%c0_14, %c0_15, %c0_16], %34 {strides = array<i32>} : memref<2x6x128xf32, #tpu.memory_space<vmem>>, vector<1x1x128xf32>,
    %35 = arith.mulf %24, %25 : vector<32x128xf32>
    %cst_17 = arith.constant dense<0.000000e+00> : vector<128xf32>
    %36 = vector.multi_reduction <add>, %35, %cst_17 [0] : vector<32x128xf32> to vector<128xf32>
    %c0_18 = arith.constant 0 : index
    %c1_19 = arith.constant 1 : index
    %c0_20 = arith.constant 0 : index
    %37 = vector.load %arg5[%c0_18, %c1_19, %c0_20] : memref<2x6x128xf32, #tpu.memory_space<vmem>>, vector<1x1x128xf32>
    %38 = vector.shape_cast %37 : vector<1x1x128xf32> to vector<128xf32>
    %39 = arith.addf %38, %36 : vector<128xf32>
    %c0_21 = arith.constant 0 : index
    %c1_22 = arith.constant 1 : index
    %c0_23 = arith.constant 0 : index
    %40 = vector.load %arg5[%c0_21, %c1_22, %c0_23] : memref<2x6x128xf32, #tpu.memory_space<vmem>>, vector<1x1x128xf32>
    %41 = vector.shape_cast %40 : vector<1x1x128xf32> to vector<128xf32>
    %42 = vector.shape_cast %39 : vector<128xf32> to vector<1x1x128xf32>
    tpu.vector_store %arg5[%c0_21, %c1_22, %c0_23], %42 {strides = array<i32>} : memref<2x6x128xf32, #tpu.memory_space<vmem>>, vector<1x1x128xf32>,
    %43 = arith.mulf %24, %26 : vector<32x128xf32>
    %cst_24 = arith.constant dense<0.000000e+00> : vector<128xf32>
    %44 = vector.multi_reduction <add>, %43, %cst_24 [0] : vector<32x128xf32> to vector<128xf32>
    %c0_25 = arith.constant 0 : index
    %c2_26 = arith.constant 2 : index
    %c0_27 = arith.constant 0 : index
    %45 = vector.load %arg5[%c0_25, %c2_26, %c0_27] : memref<2x6x128xf32, #tpu.memory_space<vmem>>, vector<1x1x128xf32>
    %46 = vector.shape_cast %45 : vector<1x1x128xf32> to vector<128xf32>
    %47 = arith.addf %46, %44 : vector<128xf32>
    %c0_28 = arith.constant 0 : index
    %c2_29 = arith.constant 2 : index
    %c0_30 = arith.constant 0 : index
    %48 = vector.load %arg5[%c0_28, %c2_29, %c0_30] : memref<2x6x128xf32, #tpu.memory_space<vmem>>, vector<1x1x128xf32>
    %49 = vector.shape_cast %48 : vector<1x1x128xf32> to vector<128xf32>
    %50 = vector.shape_cast %47 : vector<128xf32> to vector<1x1x128xf32>
    tpu.vector_store %arg5[%c0_28, %c2_29, %c0_30], %50 {strides = array<i32>} : memref<2x6x128xf32, #tpu.memory_space<vmem>>, vector<1x1x128xf32>,
    %51 = arith.mulf %25, %25 : vector<32x128xf32>
    %cst_31 = arith.constant dense<0.000000e+00> : vector<128xf32>
    %52 = vector.multi_reduction <add>, %51, %cst_31 [0] : vector<32x128xf32> to vector<128xf32>
    %c0_32 = arith.constant 0 : index
    %c3 = arith.constant 3 : index
    %c0_33 = arith.constant 0 : index
    %53 = vector.load %arg5[%c0_32, %c3, %c0_33] : memref<2x6x128xf32, #tpu.memory_space<vmem>>, vector<1x1x128xf32>
    %54 = vector.shape_cast %53 : vector<1x1x128xf32> to vector<128xf32>
    %55 = arith.addf %54, %52 : vector<128xf32>
    %c0_34 = arith.constant 0 : index
    %c3_35 = arith.constant 3 : index
    %c0_36 = arith.constant 0 : index
    %56 = vector.load %arg5[%c0_34, %c3_35, %c0_36] : memref<2x6x128xf32, #tpu.memory_space<vmem>>, vector<1x1x128xf32>
    %57 = vector.shape_cast %56 : vector<1x1x128xf32> to vector<128xf32>
    %58 = vector.shape_cast %55 : vector<128xf32> to vector<1x1x128xf32>
    tpu.vector_store %arg5[%c0_34, %c3_35, %c0_36], %58 {strides = array<i32>} : memref<2x6x128xf32, #tpu.memory_space<vmem>>, vector<1x1x128xf32>,
    %59 = arith.mulf %25, %26 : vector<32x128xf32>
    %cst_37 = arith.constant dense<0.000000e+00> : vector<128xf32>
    %60 = vector.multi_reduction <add>, %59, %cst_37 [0] : vector<32x128xf32> to vector<128xf32>
    %c0_38 = arith.constant 0 : index
    %c4 = arith.constant 4 : index
    %c0_39 = arith.constant 0 : index
    %61 = vector.load %arg5[%c0_38, %c4, %c0_39] : memref<2x6x128xf32, #tpu.memory_space<vmem>>, vector<1x1x128xf32>
    %62 = vector.shape_cast %61 : vector<1x1x128xf32> to vector<128xf32>
    %63 = arith.addf %62, %60 : vector<128xf32>
    %c0_40 = arith.constant 0 : index
    %c4_41 = arith.constant 4 : index
    %c0_42 = arith.constant 0 : index
    %64 = vector.load %arg5[%c0_40, %c4_41, %c0_42] : memref<2x6x128xf32, #tpu.memory_space<vmem>>, vector<1x1x128xf32>
    %65 = vector.shape_cast %64 : vector<1x1x128xf32> to vector<128xf32>
    %66 = vector.shape_cast %63 : vector<128xf32> to vector<1x1x128xf32>
    tpu.vector_store %arg5[%c0_40, %c4_41, %c0_42], %66 {strides = array<i32>} : memref<2x6x128xf32, #tpu.memory_space<vmem>>, vector<1x1x128xf32>,
    %67 = arith.mulf %26, %26 : vector<32x128xf32>
    %cst_43 = arith.constant dense<0.000000e+00> : vector<128xf32>
    %68 = vector.multi_reduction <add>, %67, %cst_43 [0] : vector<32x128xf32> to vector<128xf32>
    %c0_44 = arith.constant 0 : index
    %c5 = arith.constant 5 : index
    %c0_45 = arith.constant 0 : index
    %69 = vector.load %arg5[%c0_44, %c5, %c0_45] : memref<2x6x128xf32, #tpu.memory_space<vmem>>, vector<1x1x128xf32>
    %70 = vector.shape_cast %69 : vector<1x1x128xf32> to vector<128xf32>
    %71 = arith.addf %70, %68 : vector<128xf32>
    %c0_46 = arith.constant 0 : index
    %c5_47 = arith.constant 5 : index
    %c0_48 = arith.constant 0 : index
    %72 = vector.load %arg5[%c0_46, %c5_47, %c0_48] : memref<2x6x128xf32, #tpu.memory_space<vmem>>, vector<1x1x128xf32>
    %73 = vector.shape_cast %72 : vector<1x1x128xf32> to vector<128xf32>
    %74 = vector.shape_cast %71 : vector<128xf32> to vector<1x1x128xf32>
    tpu.vector_store %arg5[%c0_46, %c5_47, %c0_48], %74 {strides = array<i32>} : memref<2x6x128xf32, #tpu.memory_space<vmem>>, vector<1x1x128xf32>,
    %c0_49 = arith.constant 0 : index
    %c0_50 = arith.constant 0 : index
    %c0_51 = arith.constant 0 : index
    %c0_52 = arith.constant 0 : index
    %75 = vector.load %arg2[%c0_49, %c0_50, %c0_51, %c0_52] : memref<2x3x32x128xf32, #tpu.memory_space<vmem>>, vector<1x1x32x128xf32>
    %76 = vector.shape_cast %75 : vector<1x1x32x128xf32> to vector<32x128xf32>
    %c0_53 = arith.constant 0 : index
    %c1_54 = arith.constant 1 : index
    %c0_55 = arith.constant 0 : index
    %c0_56 = arith.constant 0 : index
    %77 = vector.load %arg2[%c0_53, %c1_54, %c0_55, %c0_56] : memref<2x3x32x128xf32, #tpu.memory_space<vmem>>, vector<1x1x32x128xf32>
    %78 = vector.shape_cast %77 : vector<1x1x32x128xf32> to vector<32x128xf32>
    %c0_57 = arith.constant 0 : index
    %c2_58 = arith.constant 2 : index
    %c0_59 = arith.constant 0 : index
    %c0_60 = arith.constant 0 : index
    %79 = vector.load %arg2[%c0_57, %c2_58, %c0_59, %c0_60] : memref<2x3x32x128xf32, #tpu.memory_space<vmem>>, vector<1x1x32x128xf32>
    %80 = vector.shape_cast %79 : vector<1x1x32x128xf32> to vector<32x128xf32>
    %81 = arith.maximumf %76, %78 : vector<32x128xf32>
    %82 = arith.maximumf %81, %80 : vector<32x128xf32>
    %83 = arith.subf %76, %82 : vector<32x128xf32>
    %84 = math.exp %83 : vector<32x128xf32>
    %85 = arith.subf %78, %82 : vector<32x128xf32>
    %86 = math.exp %85 : vector<32x128xf32>
    %87 = arith.subf %80, %82 : vector<32x128xf32>
    %88 = math.exp %87 : vector<32x128xf32>
    %89 = arith.addf %84, %86 : vector<32x128xf32>
    %90 = arith.addf %89, %88 : vector<32x128xf32>
    %91 = tpu.reciprocal %90 {approx = true} : vector<32x128xf32> -> vector<32x128xf32>
    %92 = arith.mulf %90, %91 : vector<32x128xf32>
    %cst_61 = arith.constant 2.000000e+00 : f32
    %93 = vector.broadcast %cst_61 : f32 to vector<32x128xf32>
    %94 = arith.subf %93, %92 : vector<32x128xf32>
    %95 = arith.mulf %91, %94 : vector<32x128xf32>
    %96 = arith.mulf %84, %95 : vector<32x128xf32>
    %97 = arith.mulf %86, %95 : vector<32x128xf32>
    %98 = arith.mulf %88, %95 : vector<32x128xf32>
    %99 = arith.mulf %96, %96 : vector<32x128xf32>
    %cst_62 = arith.constant dense<0.000000e+00> : vector<128xf32>
    %100 = vector.multi_reduction <add>, %99, %cst_62 [0] : vector<32x128xf32> to vector<128xf32>
    %c0_63 = arith.constant 0 : index
    %c0_64 = arith.constant 0 : index
    %c0_65 = arith.constant 0 : index
    %101 = vector.load %arg6[%c0_63, %c0_64, %c0_65] : memref<2x6x128xf32, #tpu.memory_space<vmem>>, vector<1x1x128xf32>
    %102 = vector.shape_cast %101 : vector<1x1x128xf32> to vector<128xf32>
    %103 = arith.addf %102, %100 : vector<128xf32>
    %c0_66 = arith.constant 0 : index
    %c0_67 = arith.constant 0 : index
    %c0_68 = arith.constant 0 : index
    %104 = vector.load %arg6[%c0_66, %c0_67, %c0_68] : memref<2x6x128xf32, #tpu.memory_space<vmem>>, vector<1x1x128xf32>
    %105 = vector.shape_cast %104 : vector<1x1x128xf32> to vector<128xf32>
    %106 = vector.shape_cast %103 : vector<128xf32> to vector<1x1x128xf32>
    tpu.vector_store %arg6[%c0_66, %c0_67, %c0_68], %106 {strides = array<i32>} : memref<2x6x128xf32, #tpu.memory_space<vmem>>, vector<1x1x128xf32>,
    %107 = arith.mulf %96, %97 : vector<32x128xf32>
    %cst_69 = arith.constant dense<0.000000e+00> : vector<128xf32>
    %108 = vector.multi_reduction <add>, %107, %cst_69 [0] : vector<32x128xf32> to vector<128xf32>
    %c0_70 = arith.constant 0 : index
    %c1_71 = arith.constant 1 : index
    %c0_72 = arith.constant 0 : index
    %109 = vector.load %arg6[%c0_70, %c1_71, %c0_72] : memref<2x6x128xf32, #tpu.memory_space<vmem>>, vector<1x1x128xf32>
    %110 = vector.shape_cast %109 : vector<1x1x128xf32> to vector<128xf32>
    %111 = arith.addf %110, %108 : vector<128xf32>
    %c0_73 = arith.constant 0 : index
    %c1_74 = arith.constant 1 : index
    %c0_75 = arith.constant 0 : index
    %112 = vector.load %arg6[%c0_73, %c1_74, %c0_75] : memref<2x6x128xf32, #tpu.memory_space<vmem>>, vector<1x1x128xf32>
    %113 = vector.shape_cast %112 : vector<1x1x128xf32> to vector<128xf32>
    %114 = vector.shape_cast %111 : vector<128xf32> to vector<1x1x128xf32>
    tpu.vector_store %arg6[%c0_73, %c1_74, %c0_75], %114 {strides = array<i32>} : memref<2x6x128xf32, #tpu.memory_space<vmem>>, vector<1x1x128xf32>,
    %115 = arith.mulf %96, %98 : vector<32x128xf32>
    %cst_76 = arith.constant dense<0.000000e+00> : vector<128xf32>
    %116 = vector.multi_reduction <add>, %115, %cst_76 [0] : vector<32x128xf32> to vector<128xf32>
    %c0_77 = arith.constant 0 : index
    %c2_78 = arith.constant 2 : index
    %c0_79 = arith.constant 0 : index
    %117 = vector.load %arg6[%c0_77, %c2_78, %c0_79] : memref<2x6x128xf32, #tpu.memory_space<vmem>>, vector<1x1x128xf32>
    %118 = vector.shape_cast %117 : vector<1x1x128xf32> to vector<128xf32>
    %119 = arith.addf %118, %116 : vector<128xf32>
    %c0_80 = arith.constant 0 : index
    %c2_81 = arith.constant 2 : index
    %c0_82 = arith.constant 0 : index
    %120 = vector.load %arg6[%c0_80, %c2_81, %c0_82] : memref<2x6x128xf32, #tpu.memory_space<vmem>>, vector<1x1x128xf32>
    %121 = vector.shape_cast %120 : vector<1x1x128xf32> to vector<128xf32>
    %122 = vector.shape_cast %119 : vector<128xf32> to vector<1x1x128xf32>
    tpu.vector_store %arg6[%c0_80, %c2_81, %c0_82], %122 {strides = array<i32>} : memref<2x6x128xf32, #tpu.memory_space<vmem>>, vector<1x1x128xf32>,
    %123 = arith.mulf %97, %97 : vector<32x128xf32>
    %cst_83 = arith.constant dense<0.000000e+00> : vector<128xf32>
    %124 = vector.multi_reduction <add>, %123, %cst_83 [0] : vector<32x128xf32> to vector<128xf32>
    %c0_84 = arith.constant 0 : index
    %c3_85 = arith.constant 3 : index
    %c0_86 = arith.constant 0 : index
    %125 = vector.load %arg6[%c0_84, %c3_85, %c0_86] : memref<2x6x128xf32, #tpu.memory_space<vmem>>, vector<1x1x128xf32>
    %126 = vector.shape_cast %125 : vector<1x1x128xf32> to vector<128xf32>
    %127 = arith.addf %126, %124 : vector<128xf32>
    %c0_87 = arith.constant 0 : index
    %c3_88 = arith.constant 3 : index
    %c0_89 = arith.constant 0 : index
    %128 = vector.load %arg6[%c0_87, %c3_88, %c0_89] : memref<2x6x128xf32, #tpu.memory_space<vmem>>, vector<1x1x128xf32>
    %129 = vector.shape_cast %128 : vector<1x1x128xf32> to vector<128xf32>
    %130 = vector.shape_cast %127 : vector<128xf32> to vector<1x1x128xf32>
    tpu.vector_store %arg6[%c0_87, %c3_88, %c0_89], %130 {strides = array<i32>} : memref<2x6x128xf32, #tpu.memory_space<vmem>>, vector<1x1x128xf32>,
    %131 = arith.mulf %97, %98 : vector<32x128xf32>
    %cst_90 = arith.constant dense<0.000000e+00> : vector<128xf32>
    %132 = vector.multi_reduction <add>, %131, %cst_90 [0] : vector<32x128xf32> to vector<128xf32>
    %c0_91 = arith.constant 0 : index
    %c4_92 = arith.constant 4 : index
    %c0_93 = arith.constant 0 : index
    %133 = vector.load %arg6[%c0_91, %c4_92, %c0_93] : memref<2x6x128xf32, #tpu.memory_space<vmem>>, vector<1x1x128xf32>
    %134 = vector.shape_cast %133 : vector<1x1x128xf32> to vector<128xf32>
    %135 = arith.addf %134, %132 : vector<128xf32>
    %c0_94 = arith.constant 0 : index
    %c4_95 = arith.constant 4 : index
    %c0_96 = arith.constant 0 : index
    %136 = vector.load %arg6[%c0_94, %c4_95, %c0_96] : memref<2x6x128xf32, #tpu.memory_space<vmem>>, vector<1x1x128xf32>
    %137 = vector.shape_cast %136 : vector<1x1x128xf32> to vector<128xf32>
    %138 = vector.shape_cast %135 : vector<128xf32> to vector<1x1x128xf32>
    tpu.vector_store %arg6[%c0_94, %c4_95, %c0_96], %138 {strides = array<i32>} : memref<2x6x128xf32, #tpu.memory_space<vmem>>, vector<1x1x128xf32>,
    %139 = arith.mulf %98, %98 : vector<32x128xf32>
    %cst_97 = arith.constant dense<0.000000e+00> : vector<128xf32>
    %140 = vector.multi_reduction <add>, %139, %cst_97 [0] : vector<32x128xf32> to vector<128xf32>
    %c0_98 = arith.constant 0 : index
    %c5_99 = arith.constant 5 : index
    %c0_100 = arith.constant 0 : index
    %141 = vector.load %arg6[%c0_98, %c5_99, %c0_100] : memref<2x6x128xf32, #tpu.memory_space<vmem>>, vector<1x1x128xf32>
    %142 = vector.shape_cast %141 : vector<1x1x128xf32> to vector<128xf32>
    %143 = arith.addf %142, %140 : vector<128xf32>
    %c0_101 = arith.constant 0 : index
    %c5_102 = arith.constant 5 : index
    %c0_103 = arith.constant 0 : index
    %144 = vector.load %arg6[%c0_101, %c5_102, %c0_103] : memref<2x6x128xf32, #tpu.memory_space<vmem>>, vector<1x1x128xf32>
    %145 = vector.shape_cast %144 : vector<1x1x128xf32> to vector<128xf32>
    %146 = vector.shape_cast %143 : vector<128xf32> to vector<1x1x128xf32>
    tpu.vector_store %arg6[%c0_101, %c5_102, %c0_103], %146 {strides = array<i32>} : memref<2x6x128xf32, #tpu.memory_space<vmem>>, vector<1x1x128xf32>,
    %c1_104 = arith.constant 1 : index
    %c0_105 = arith.constant 0 : index
    %c0_106 = arith.constant 0 : index
    %c0_107 = arith.constant 0 : index
    %147 = vector.load %arg1[%c1_104, %c0_105, %c0_106, %c0_107] : memref<2x3x32x128xf32, #tpu.memory_space<vmem>>, vector<1x1x32x128xf32>
    %148 = vector.shape_cast %147 : vector<1x1x32x128xf32> to vector<32x128xf32>
    %c1_108 = arith.constant 1 : index
    %c1_109 = arith.constant 1 : index
    %c0_110 = arith.constant 0 : index
    %c0_111 = arith.constant 0 : index
    %149 = vector.load %arg1[%c1_108, %c1_109, %c0_110, %c0_111] : memref<2x3x32x128xf32, #tpu.memory_space<vmem>>, vector<1x1x32x128xf32>
    %150 = vector.shape_cast %149 : vector<1x1x32x128xf32> to vector<32x128xf32>
    %c1_112 = arith.constant 1 : index
    %c2_113 = arith.constant 2 : index
    %c0_114 = arith.constant 0 : index
    %c0_115 = arith.constant 0 : index
    %151 = vector.load %arg1[%c1_112, %c2_113, %c0_114, %c0_115] : memref<2x3x32x128xf32, #tpu.memory_space<vmem>>, vector<1x1x32x128xf32>
    %152 = vector.shape_cast %151 : vector<1x1x32x128xf32> to vector<32x128xf32>
    %153 = arith.maximumf %148, %150 : vector<32x128xf32>
    %154 = arith.maximumf %153, %152 : vector<32x128xf32>
    %155 = arith.subf %148, %154 : vector<32x128xf32>
    %156 = math.exp %155 : vector<32x128xf32>
    %157 = arith.subf %150, %154 : vector<32x128xf32>
    %158 = math.exp %157 : vector<32x128xf32>
    %159 = arith.subf %152, %154 : vector<32x128xf32>
    %160 = math.exp %159 : vector<32x128xf32>
    %161 = arith.addf %156, %158 : vector<32x128xf32>
    %162 = arith.addf %161, %160 : vector<32x128xf32>
    %163 = tpu.reciprocal %162 {approx = true} : vector<32x128xf32> -> vector<32x128xf32>
    %164 = arith.mulf %162, %163 : vector<32x128xf32>
    %cst_116 = arith.constant 2.000000e+00 : f32
    %165 = vector.broadcast %cst_116 : f32 to vector<32x128xf32>
    %166 = arith.subf %165, %164 : vector<32x128xf32>
    %167 = arith.mulf %163, %166 : vector<32x128xf32>
    %168 = arith.mulf %156, %167 : vector<32x128xf32>
    %169 = arith.mulf %158, %167 : vector<32x128xf32>
    %170 = arith.mulf %160, %167 : vector<32x128xf32>
    %171 = arith.mulf %168, %168 : vector<32x128xf32>
    %cst_117 = arith.constant dense<0.000000e+00> : vector<128xf32>
    %172 = vector.multi_reduction <add>, %171, %cst_117 [0] : vector<32x128xf32> to vector<128xf32>
    %c1_118 = arith.constant 1 : index
    %c0_119 = arith.constant 0 : index
    %c0_120 = arith.constant 0 : index
    %173 = vector.load %arg5[%c1_118, %c0_119, %c0_120] : memref<2x6x128xf32, #tpu.memory_space<vmem>>, vector<1x1x128xf32>
    %174 = vector.shape_cast %173 : vector<1x1x128xf32> to vector<128xf32>
    %175 = arith.addf %174, %172 : vector<128xf32>
    %c1_121 = arith.constant 1 : index
    %c0_122 = arith.constant 0 : index
    %c0_123 = arith.constant 0 : index
    %176 = vector.load %arg5[%c1_121, %c0_122, %c0_123] : memref<2x6x128xf32, #tpu.memory_space<vmem>>, vector<1x1x128xf32>
    %177 = vector.shape_cast %176 : vector<1x1x128xf32> to vector<128xf32>
    %178 = vector.shape_cast %175 : vector<128xf32> to vector<1x1x128xf32>
    tpu.vector_store %arg5[%c1_121, %c0_122, %c0_123], %178 {strides = array<i32>} : memref<2x6x128xf32, #tpu.memory_space<vmem>>, vector<1x1x128xf32>,
    %179 = arith.mulf %168, %169 : vector<32x128xf32>
    %cst_124 = arith.constant dense<0.000000e+00> : vector<128xf32>
    %180 = vector.multi_reduction <add>, %179, %cst_124 [0] : vector<32x128xf32> to vector<128xf32>
    %c1_125 = arith.constant 1 : index
    %c1_126 = arith.constant 1 : index
    %c0_127 = arith.constant 0 : index
    %181 = vector.load %arg5[%c1_125, %c1_126, %c0_127] : memref<2x6x128xf32, #tpu.memory_space<vmem>>, vector<1x1x128xf32>
    %182 = vector.shape_cast %181 : vector<1x1x128xf32> to vector<128xf32>
    %183 = arith.addf %182, %180 : vector<128xf32>
    %c1_128 = arith.constant 1 : index
    %c1_129 = arith.constant 1 : index
    %c0_130 = arith.constant 0 : index
    %184 = vector.load %arg5[%c1_128, %c1_129, %c0_130] : memref<2x6x128xf32, #tpu.memory_space<vmem>>, vector<1x1x128xf32>
    %185 = vector.shape_cast %184 : vector<1x1x128xf32> to vector<128xf32>
    %186 = vector.shape_cast %183 : vector<128xf32> to vector<1x1x128xf32>
    tpu.vector_store %arg5[%c1_128, %c1_129, %c0_130], %186 {strides = array<i32>} : memref<2x6x128xf32, #tpu.memory_space<vmem>>, vector<1x1x128xf32>,
    %187 = arith.mulf %168, %170 : vector<32x128xf32>
    %cst_131 = arith.constant dense<0.000000e+00> : vector<128xf32>
    %188 = vector.multi_reduction <add>, %187, %cst_131 [0] : vector<32x128xf32> to vector<128xf32>
    %c1_132 = arith.constant 1 : index
    %c2_133 = arith.constant 2 : index
    %c0_134 = arith.constant 0 : index
    %189 = vector.load %arg5[%c1_132, %c2_133, %c0_134] : memref<2x6x128xf32, #tpu.memory_space<vmem>>, vector<1x1x128xf32>
    %190 = vector.shape_cast %189 : vector<1x1x128xf32> to vector<128xf32>
    %191 = arith.addf %190, %188 : vector<128xf32>
    %c1_135 = arith.constant 1 : index
    %c2_136 = arith.constant 2 : index
    %c0_137 = arith.constant 0 : index
    %192 = vector.load %arg5[%c1_135, %c2_136, %c0_137] : memref<2x6x128xf32, #tpu.memory_space<vmem>>, vector<1x1x128xf32>
    %193 = vector.shape_cast %192 : vector<1x1x128xf32> to vector<128xf32>
    %194 = vector.shape_cast %191 : vector<128xf32> to vector<1x1x128xf32>
    tpu.vector_store %arg5[%c1_135, %c2_136, %c0_137], %194 {strides = array<i32>} : memref<2x6x128xf32, #tpu.memory_space<vmem>>, vector<1x1x128xf32>,
    %195 = arith.mulf %169, %169 : vector<32x128xf32>
    %cst_138 = arith.constant dense<0.000000e+00> : vector<128xf32>
    %196 = vector.multi_reduction <add>, %195, %cst_138 [0] : vector<32x128xf32> to vector<128xf32>
    %c1_139 = arith.constant 1 : index
    %c3_140 = arith.constant 3 : index
    %c0_141 = arith.constant 0 : index
    %197 = vector.load %arg5[%c1_139, %c3_140, %c0_141] : memref<2x6x128xf32, #tpu.memory_space<vmem>>, vector<1x1x128xf32>
    %198 = vector.shape_cast %197 : vector<1x1x128xf32> to vector<128xf32>
    %199 = arith.addf %198, %196 : vector<128xf32>
    %c1_142 = arith.constant 1 : index
    %c3_143 = arith.constant 3 : index
    %c0_144 = arith.constant 0 : index
    %200 = vector.load %arg5[%c1_142, %c3_143, %c0_144] : memref<2x6x128xf32, #tpu.memory_space<vmem>>, vector<1x1x128xf32>
    %201 = vector.shape_cast %200 : vector<1x1x128xf32> to vector<128xf32>
    %202 = vector.shape_cast %199 : vector<128xf32> to vector<1x1x128xf32>
    tpu.vector_store %arg5[%c1_142, %c3_143, %c0_144], %202 {strides = array<i32>} : memref<2x6x128xf32, #tpu.memory_space<vmem>>, vector<1x1x128xf32>,
    %203 = arith.mulf %169, %170 : vector<32x128xf32>
    %cst_145 = arith.constant dense<0.000000e+00> : vector<128xf32>
    %204 = vector.multi_reduction <add>, %203, %cst_145 [0] : vector<32x128xf32> to vector<128xf32>
    %c1_146 = arith.constant 1 : index
    %c4_147 = arith.constant 4 : index
    %c0_148 = arith.constant 0 : index
    %205 = vector.load %arg5[%c1_146, %c4_147, %c0_148] : memref<2x6x128xf32, #tpu.memory_space<vmem>>, vector<1x1x128xf32>
    %206 = vector.shape_cast %205 : vector<1x1x128xf32> to vector<128xf32>
    %207 = arith.addf %206, %204 : vector<128xf32>
    %c1_149 = arith.constant 1 : index
    %c4_150 = arith.constant 4 : index
    %c0_151 = arith.constant 0 : index
    %208 = vector.load %arg5[%c1_149, %c4_150, %c0_151] : memref<2x6x128xf32, #tpu.memory_space<vmem>>, vector<1x1x128xf32>
    %209 = vector.shape_cast %208 : vector<1x1x128xf32> to vector<128xf32>
    %210 = vector.shape_cast %207 : vector<128xf32> to vector<1x1x128xf32>
    tpu.vector_store %arg5[%c1_149, %c4_150, %c0_151], %210 {strides = array<i32>} : memref<2x6x128xf32, #tpu.memory_space<vmem>>, vector<1x1x128xf32>,
    %211 = arith.mulf %170, %170 : vector<32x128xf32>
    %cst_152 = arith.constant dense<0.000000e+00> : vector<128xf32>
    %212 = vector.multi_reduction <add>, %211, %cst_152 [0] : vector<32x128xf32> to vector<128xf32>
    %c1_153 = arith.constant 1 : index
    %c5_154 = arith.constant 5 : index
    %c0_155 = arith.constant 0 : index
    %213 = vector.load %arg5[%c1_153, %c5_154, %c0_155] : memref<2x6x128xf32, #tpu.memory_space<vmem>>, vector<1x1x128xf32>
    %214 = vector.shape_cast %213 : vector<1x1x128xf32> to vector<128xf32>
    %215 = arith.addf %214, %212 : vector<128xf32>
    %c1_156 = arith.constant 1 : index
    %c5_157 = arith.constant 5 : index
    %c0_158 = arith.constant 0 : index
    %216 = vector.load %arg5[%c1_156, %c5_157, %c0_158] : memref<2x6x128xf32, #tpu.memory_space<vmem>>, vector<1x1x128xf32>
    %217 = vector.shape_cast %216 : vector<1x1x128xf32> to vector<128xf32>
    %218 = vector.shape_cast %215 : vector<128xf32> to vector<1x1x128xf32>
    tpu.vector_store %arg5[%c1_156, %c5_157, %c0_158], %218 {strides = array<i32>} : memref<2x6x128xf32, #tpu.memory_space<vmem>>, vector<1x1x128xf32>,
    %c1_159 = arith.constant 1 : index
    %c0_160 = arith.constant 0 : index
    %c0_161 = arith.constant 0 : index
    %c0_162 = arith.constant 0 : index
    %219 = vector.load %arg2[%c1_159, %c0_160, %c0_161, %c0_162] : memref<2x3x32x128xf32, #tpu.memory_space<vmem>>, vector<1x1x32x128xf32>
    %220 = vector.shape_cast %219 : vector<1x1x32x128xf32> to vector<32x128xf32>
    %c1_163 = arith.constant 1 : index
    %c1_164 = arith.constant 1 : index
    %c0_165 = arith.constant 0 : index
    %c0_166 = arith.constant 0 : index
    %221 = vector.load %arg2[%c1_163, %c1_164, %c0_165, %c0_166] : memref<2x3x32x128xf32, #tpu.memory_space<vmem>>, vector<1x1x32x128xf32>
    %222 = vector.shape_cast %221 : vector<1x1x32x128xf32> to vector<32x128xf32>
    %c1_167 = arith.constant 1 : index
    %c2_168 = arith.constant 2 : index
    %c0_169 = arith.constant 0 : index
    %c0_170 = arith.constant 0 : index
    %223 = vector.load %arg2[%c1_167, %c2_168, %c0_169, %c0_170] : memref<2x3x32x128xf32, #tpu.memory_space<vmem>>, vector<1x1x32x128xf32>
    %224 = vector.shape_cast %223 : vector<1x1x32x128xf32> to vector<32x128xf32>
    %225 = arith.maximumf %220, %222 : vector<32x128xf32>
    %226 = arith.maximumf %225, %224 : vector<32x128xf32>
    %227 = arith.subf %220, %226 : vector<32x128xf32>
    %228 = math.exp %227 : vector<32x128xf32>
    %229 = arith.subf %222, %226 : vector<32x128xf32>
    %230 = math.exp %229 : vector<32x128xf32>
    %231 = arith.subf %224, %226 : vector<32x128xf32>
    %232 = math.exp %231 : vector<32x128xf32>
    %233 = arith.addf %228, %230 : vector<32x128xf32>
    %234 = arith.addf %233, %232 : vector<32x128xf32>
    %235 = tpu.reciprocal %234 {approx = true} : vector<32x128xf32> -> vector<32x128xf32>
    %236 = arith.mulf %234, %235 : vector<32x128xf32>
    %cst_171 = arith.constant 2.000000e+00 : f32
    %237 = vector.broadcast %cst_171 : f32 to vector<32x128xf32>
    %238 = arith.subf %237, %236 : vector<32x128xf32>
    %239 = arith.mulf %235, %238 : vector<32x128xf32>
    %240 = arith.mulf %228, %239 : vector<32x128xf32>
    %241 = arith.mulf %230, %239 : vector<32x128xf32>
    %242 = arith.mulf %232, %239 : vector<32x128xf32>
    %243 = arith.mulf %240, %240 : vector<32x128xf32>
    %cst_172 = arith.constant dense<0.000000e+00> : vector<128xf32>
    %244 = vector.multi_reduction <add>, %243, %cst_172 [0] : vector<32x128xf32> to vector<128xf32>
    %c1_173 = arith.constant 1 : index
    %c0_174 = arith.constant 0 : index
    %c0_175 = arith.constant 0 : index
    %245 = vector.load %arg6[%c1_173, %c0_174, %c0_175] : memref<2x6x128xf32, #tpu.memory_space<vmem>>, vector<1x1x128xf32>
    %246 = vector.shape_cast %245 : vector<1x1x128xf32> to vector<128xf32>
    %247 = arith.addf %246, %244 : vector<128xf32>
    %c1_176 = arith.constant 1 : index
    %c0_177 = arith.constant 0 : index
    %c0_178 = arith.constant 0 : index
    %248 = vector.load %arg6[%c1_176, %c0_177, %c0_178] : memref<2x6x128xf32, #tpu.memory_space<vmem>>, vector<1x1x128xf32>
    %249 = vector.shape_cast %248 : vector<1x1x128xf32> to vector<128xf32>
    %250 = vector.shape_cast %247 : vector<128xf32> to vector<1x1x128xf32>
    tpu.vector_store %arg6[%c1_176, %c0_177, %c0_178], %250 {strides = array<i32>} : memref<2x6x128xf32, #tpu.memory_space<vmem>>, vector<1x1x128xf32>,
    %251 = arith.mulf %240, %241 : vector<32x128xf32>
    %cst_179 = arith.constant dense<0.000000e+00> : vector<128xf32>
    %252 = vector.multi_reduction <add>, %251, %cst_179 [0] : vector<32x128xf32> to vector<128xf32>
    %c1_180 = arith.constant 1 : index
    %c1_181 = arith.constant 1 : index
    %c0_182 = arith.constant 0 : index
    %253 = vector.load %arg6[%c1_180, %c1_181, %c0_182] : memref<2x6x128xf32, #tpu.memory_space<vmem>>, vector<1x1x128xf32>
    %254 = vector.shape_cast %253 : vector<1x1x128xf32> to vector<128xf32>
    %255 = arith.addf %254, %252 : vector<128xf32>
    %c1_183 = arith.constant 1 : index
    %c1_184 = arith.constant 1 : index
    %c0_185 = arith.constant 0 : index
    %256 = vector.load %arg6[%c1_183, %c1_184, %c0_185] : memref<2x6x128xf32, #tpu.memory_space<vmem>>, vector<1x1x128xf32>
    %257 = vector.shape_cast %256 : vector<1x1x128xf32> to vector<128xf32>
    %258 = vector.shape_cast %255 : vector<128xf32> to vector<1x1x128xf32>
    tpu.vector_store %arg6[%c1_183, %c1_184, %c0_185], %258 {strides = array<i32>} : memref<2x6x128xf32, #tpu.memory_space<vmem>>, vector<1x1x128xf32>,
    %259 = arith.mulf %240, %242 : vector<32x128xf32>
    %cst_186 = arith.constant dense<0.000000e+00> : vector<128xf32>
    %260 = vector.multi_reduction <add>, %259, %cst_186 [0] : vector<32x128xf32> to vector<128xf32>
    %c1_187 = arith.constant 1 : index
    %c2_188 = arith.constant 2 : index
    %c0_189 = arith.constant 0 : index
    %261 = vector.load %arg6[%c1_187, %c2_188, %c0_189] : memref<2x6x128xf32, #tpu.memory_space<vmem>>, vector<1x1x128xf32>
    %262 = vector.shape_cast %261 : vector<1x1x128xf32> to vector<128xf32>
    %263 = arith.addf %262, %260 : vector<128xf32>
    %c1_190 = arith.constant 1 : index
    %c2_191 = arith.constant 2 : index
    %c0_192 = arith.constant 0 : index
    %264 = vector.load %arg6[%c1_190, %c2_191, %c0_192] : memref<2x6x128xf32, #tpu.memory_space<vmem>>, vector<1x1x128xf32>
    %265 = vector.shape_cast %264 : vector<1x1x128xf32> to vector<128xf32>
    %266 = vector.shape_cast %263 : vector<128xf32> to vector<1x1x128xf32>
    tpu.vector_store %arg6[%c1_190, %c2_191, %c0_192], %266 {strides = array<i32>} : memref<2x6x128xf32, #tpu.memory_space<vmem>>, vector<1x1x128xf32>,
    %267 = arith.mulf %241, %241 : vector<32x128xf32>
    %cst_193 = arith.constant dense<0.000000e+00> : vector<128xf32>
    %268 = vector.multi_reduction <add>, %267, %cst_193 [0] : vector<32x128xf32> to vector<128xf32>
    %c1_194 = arith.constant 1 : index
    %c3_195 = arith.constant 3 : index
    %c0_196 = arith.constant 0 : index
    %269 = vector.load %arg6[%c1_194, %c3_195, %c0_196] : memref<2x6x128xf32, #tpu.memory_space<vmem>>, vector<1x1x128xf32>
    %270 = vector.shape_cast %269 : vector<1x1x128xf32> to vector<128xf32>
    %271 = arith.addf %270, %268 : vector<128xf32>
    %c1_197 = arith.constant 1 : index
    %c3_198 = arith.constant 3 : index
    %c0_199 = arith.constant 0 : index
    %272 = vector.load %arg6[%c1_197, %c3_198, %c0_199] : memref<2x6x128xf32, #tpu.memory_space<vmem>>, vector<1x1x128xf32>
    %273 = vector.shape_cast %272 : vector<1x1x128xf32> to vector<128xf32>
    %274 = vector.shape_cast %271 : vector<128xf32> to vector<1x1x128xf32>
    tpu.vector_store %arg6[%c1_197, %c3_198, %c0_199], %274 {strides = array<i32>} : memref<2x6x128xf32, #tpu.memory_space<vmem>>, vector<1x1x128xf32>,
    %275 = arith.mulf %241, %242 : vector<32x128xf32>
    %cst_200 = arith.constant dense<0.000000e+00> : vector<128xf32>
    %276 = vector.multi_reduction <add>, %275, %cst_200 [0] : vector<32x128xf32> to vector<128xf32>
    %c1_201 = arith.constant 1 : index
    %c4_202 = arith.constant 4 : index
    %c0_203 = arith.constant 0 : index
    %277 = vector.load %arg6[%c1_201, %c4_202, %c0_203] : memref<2x6x128xf32, #tpu.memory_space<vmem>>, vector<1x1x128xf32>
    %278 = vector.shape_cast %277 : vector<1x1x128xf32> to vector<128xf32>
    %279 = arith.addf %278, %276 : vector<128xf32>
    %c1_204 = arith.constant 1 : index
    %c4_205 = arith.constant 4 : index
    %c0_206 = arith.constant 0 : index
    %280 = vector.load %arg6[%c1_204, %c4_205, %c0_206] : memref<2x6x128xf32, #tpu.memory_space<vmem>>, vector<1x1x128xf32>
    %281 = vector.shape_cast %280 : vector<1x1x128xf32> to vector<128xf32>
    %282 = vector.shape_cast %279 : vector<128xf32> to vector<1x1x128xf32>
    tpu.vector_store %arg6[%c1_204, %c4_205, %c0_206], %282 {strides = array<i32>} : memref<2x6x128xf32, #tpu.memory_space<vmem>>, vector<1x1x128xf32>,
    %283 = arith.mulf %242, %242 : vector<32x128xf32>
    %cst_207 = arith.constant dense<0.000000e+00> : vector<128xf32>
    %284 = vector.multi_reduction <add>, %283, %cst_207 [0] : vector<32x128xf32> to vector<128xf32>
    %c1_208 = arith.constant 1 : index
    %c5_209 = arith.constant 5 : index
    %c0_210 = arith.constant 0 : index
    %285 = vector.load %arg6[%c1_208, %c5_209, %c0_210] : memref<2x6x128xf32, #tpu.memory_space<vmem>>, vector<1x1x128xf32>
    %286 = vector.shape_cast %285 : vector<1x1x128xf32> to vector<128xf32>
    %287 = arith.addf %286, %284 : vector<128xf32>
    %c1_211 = arith.constant 1 : index
    %c5_212 = arith.constant 5 : index
    %c0_213 = arith.constant 0 : index
    %288 = vector.load %arg6[%c1_211, %c5_212, %c0_213] : memref<2x6x128xf32, #tpu.memory_space<vmem>>, vector<1x1x128xf32>
    %289 = vector.shape_cast %288 : vector<1x1x128xf32> to vector<128xf32>
    %290 = vector.shape_cast %287 : vector<128xf32> to vector<1x1x128xf32>
    tpu.vector_store %arg6[%c1_211, %c5_212, %c0_213], %290 {strides = array<i32>} : memref<2x6x128xf32, #tpu.memory_space<vmem>>, vector<1x1x128xf32>,
    %c0_i32_214 = arith.constant 0 : i32
    %291 = arith.cmpi eq, %arg0, %c0_i32_214 : i32
    %292 = arith.extui %291 : i1 to i32
    %c0_i32_215 = arith.constant 0 : i32
    %293 = arith.cmpi ne, %292, %c0_i32_215 : i32
    scf.if %293 {
      %c0_216 = arith.constant 0 : index
      %c0_217 = arith.constant 0 : index
      %c0_218 = arith.constant 0 : index
      %294 = vector.load %arg5[%c0_216, %c0_217, %c0_218] : memref<2x6x128xf32, #tpu.memory_space<vmem>>, vector<2x6x128xf32>
      %cst_219 = arith.constant dense<0.000000e+00> : vector<2x6xf32>
      %295 = vector.multi_reduction <add>, %294, %cst_219 [2] : vector<2x6x128xf32> to vector<2x6xf32>
      %c0_220 = arith.constant 0 : index
      %c0_221 = arith.constant 0 : index
      %296 = vector.load %arg3[%c0_220, %c0_221] : memref<2x6xf32, #tpu.memory_space<vmem>>, vector<2x6xf32>
      tpu.vector_store %arg3[%c0_220, %c0_221], %295 {strides = array<i32>} : memref<2x6xf32, #tpu.memory_space<vmem>>, vector<2x6xf32>,
      %c0_222 = arith.constant 0 : index
      %c0_223 = arith.constant 0 : index
      %c0_224 = arith.constant 0 : index
      %297 = vector.load %arg6[%c0_222, %c0_223, %c0_224] : memref<2x6x128xf32, #tpu.memory_space<vmem>>, vector<2x6x128xf32>
      %cst_225 = arith.constant dense<0.000000e+00> : vector<2x6xf32>
      %298 = vector.multi_reduction <add>, %297, %cst_225 [2] : vector<2x6x128xf32> to vector<2x6xf32>
      %c0_226 = arith.constant 0 : index
      %c0_227 = arith.constant 0 : index
      %299 = vector.load %arg4[%c0_226, %c0_227] : memref<2x6xf32, #tpu.memory_space<vmem>>, vector<2x6xf32>
      tpu.vector_store %arg4[%c0_226, %c0_227], %298 {strides = array<i32>} : memref<2x6xf32, #tpu.memory_space<vmem>>, vector<2x6xf32>,
    } else {
    }
    return
  }
  func.func @transform_0(%arg0: i32) -> (i32, i32, i32, i32) {
    %c0_i32 = arith.constant 0 : i32
    %c0_i32_0 = arith.constant 0 : i32
    %c0_i32_1 = arith.constant 0 : i32
    %c0_i32_2 = arith.constant 0 : i32
    return %c0_i32, %c0_i32_0, %arg0, %c0_i32_1 : i32, i32, i32, i32
  }
  func.func @transform_1(%arg0: i32) -> (i32, i32, i32, i32) {
    %c0_i32 = arith.constant 0 : i32
    %c0_i32_0 = arith.constant 0 : i32
    %c0_i32_1 = arith.constant 0 : i32
    %c0_i32_2 = arith.constant 0 : i32
    return %c0_i32, %c0_i32_0, %arg0, %c0_i32_1 : i32, i32, i32, i32
  }
  func.func @transform_2(%arg0: i32) -> (i32, i32) {
    %c0_i32 = arith.constant 0 : i32
    %c0_i32_0 = arith.constant 0 : i32
    %c0_i32_1 = arith.constant 0 : i32
    return %c0_i32, %c0_i32_0 : i32, i32
  }
  func.func @transform_3(%arg0: i32) -> (i32, i32) {
    %c0_i32 = arith.constant 0 : i32
    %c0_i32_0 = arith.constant 0 : i32
    %c0_i32_1 = arith.constant 0 : i32
    return %c0_i32, %c0_i32_0 : i32, i32
  }
}

</mosaic_0001>

<bundles_post_ra>
// kernel: ca_loss.1
= control target key start
LH: loop header
LB: loop body
LE: loop exit
PB: predicated region body
PF: predicated region fallthrough
CT: control target
= control target key end

     0   :  { %v1012_v0 = vmov 0.0   ;;  %vm790_vm0 = vcmask 1045504   ;;  %vm809_vm1 = vcmask 1041409   ;;  %vm812_vm2 = vcmask 41984   ;;  %s1583_s1 = inlined_call_operand.vmem [shape: f32[2,3,32,128], index: 1, kind: input, shape index: {}]   ;;  %s1584_s0 = inlined_call_operand.vmem [shape: f32[2,3,32,128], index: 0, kind: input, shape index: {}]   ;;  %s1585_s3 = inlined_call_operand.vmem [shape: f32[2,6], index: 3, kind: output, shape index: {1}]   ;;  %s1586_s2 = inlined_call_operand.vmem [shape: f32[2,6], index: 2, kind: output, shape index: {0}]  }
   0x1   :  { %19 = vst [vmem:[#allocation3] sm:$0x3f] %v1012_v0  ;;  %v211_v1 = vld [vmem:[%s1583_s1] sm:$0xff]  ;;  %v212_v2 = vld [vmem:[%s1583_s1 + $0x8] sm:$0xff]  ;;  %v213_v3 = vld [vmem:[%s1583_s1 + $0x10] sm:$0xff] }
   0x2   :  { %17 = vst [vmem:[#allocation2] sm:$0x3f] %v1012_v0  ;;  %18 = vst [vmem:[#allocation2 + $0x8] sm:$0x3f] %v1012_v0  ;;  %v214_v4 = vld [vmem:[%s1583_s1 + $0x18] sm:$0xff]  ;;  %v851_v5 = vld [vmem:[%s1583_s1 + $0x20] sm:$0xff] }
   0x3   :  { %20 = vst [vmem:[#allocation3 + $0x8] sm:$0x3f] %v1012_v0  ;;  %v852_v6 = vld [vmem:[%s1583_s1 + $0x28] sm:$0xff]  ;;  %v853_v7 = vld [vmem:[%s1583_s1 + $0x30] sm:$0xff]  ;;  %v854_v8 = vld [vmem:[%s1583_s1 + $0x38] sm:$0xff]  ;;  %v225_v10 = vmax.f32 %v211_v1, %v851_v5 }
   0x4   :  { %v855_v9 = vld [vmem:[%s1583_s1 + $0x40] sm:$0xff]  ;;  %v226_v11 = vmax.f32 %v212_v2, %v852_v6  ;;  %v856_v12 = vld [vmem:[%s1583_s1 + $0x48] sm:$0xff]  ;;  %v857_v13 = vld [vmem:[%s1583_s1 + $0x50] sm:$0xff]  ;;  %v227_v15 = vmax.f32 %v213_v3, %v853_v7  ;;  %v228_v16 = vmax.f32 %v214_v4, %v854_v8 }
   0x5   :  { %v858_v14 = vld [vmem:[%s1583_s1 + $0x58] sm:$0xff]  ;;  %v229_v17 = vmax.f32 %v225_v10, %v855_v9  ;;  %v21_v29 = vld [vmem:[%s1584_s0] sm:$0xff]  ;;  %v22_v30 = vld [vmem:[%s1584_s0 + $0x8] sm:$0xff] }
   0x6   :  { %v230_v18 = vmax.f32 %v226_v11, %v856_v12  ;;  %v231_v19 = vmax.f32 %v227_v15, %v857_v13  ;;  %v232_v20 = vmax.f32 %v228_v16, %v858_v14  ;;  %v23_v34 = vld [vmem:[%s1584_s0 + $0x10] sm:$0xff]  ;;  %v24_v35 = vld [vmem:[%s1584_s0 + $0x18] sm:$0xff]  ;;  %v843_v39 = vld [vmem:[%s1584_s0 + $0x20] sm:$0xff] }
   0x7   :  { %v233_v21 = vsub.f32 %v211_v1, %v229_v17  ;;  %v245_v23 = vsub.f32 %v851_v5, %v229_v17  ;;  %v257_v33 = vsub.f32 %v855_v9, %v229_v17  ;;  %v844_v40 = vld [vmem:[%s1584_s0 + $0x28] sm:$0xff]  ;;  %v845_v44 = vld [vmem:[%s1584_s0 + $0x30] sm:$0xff]  ;;  %v846_v45 = vld [vmem:[%s1584_s0 + $0x38] sm:$0xff]  ;;  %v35_v53 = vmax.f32 %v21_v29, %v843_v39 }
   0x8   :  { %v234_v22 = vsub.f32 %v212_v2, %v230_v18  ;;  %v246_v24 = vsub.f32 %v852_v6, %v230_v18  ;;  %v235_v25 = vsub.f32 %v213_v3, %v231_v19  ;;  %v236_v26 = vsub.f32 %v214_v4, %v232_v20  ;;  %v847_v49 = vld [vmem:[%s1584_s0 + $0x40] sm:$0xff]  ;;  %v848_v51 = vld [vmem:[%s1584_s0 + $0x48] sm:$0xff]  ;;  %v1102_v52 = vld [vmem:[%s1584_s0 + $0x50] sm:$0xff] }
   0x9   :  { %v247_v27 = vsub.f32 %v853_v7, %v231_v19  ;;  %v248_v28 = vsub.f32 %v854_v8, %v232_v20  ;;  %v237_v31 = vmul.f32 1.442695, %v233_v21  ;;  %v258_v38 = vsub.f32 %v856_v12, %v230_v18  ;;  %v850_v56 = vld [vmem:[%s1584_s0 + $0x58] sm:$0xff]  ;;  %v1111_v10 = vld [vmem:[%s1583_s1 + $0x60] sm:$0xff]  ;;  %v1116_v11 = vld [vmem:[%s1583_s1 + $0x68] sm:$0xff] }
   0xa   :  { %v239_v32 = vmul.f32 1.442695, %v234_v22  ;;  %v241_v36 = vmul.f32 1.442695, %v235_v25  ;;  %v243_v37 = vmul.f32 1.442695, %v236_v26  ;;  %v259_v43 = vsub.f32 %v857_v13, %v231_v19 }
   0xb   :  { %884 = vpow2.f32 %v237_v31  ;;  %v249_v41 = vmul.f32 1.442695, %v245_v23  ;;  %v251_v42 = vmul.f32 1.442695, %v246_v24  ;;  %v253_v46 = vmul.f32 1.442695, %v247_v27 }
   0xc   :  { %886 = vpow2.f32 %v239_v32  ;;  %v255_v47 = vmul.f32 1.442695, %v248_v28  ;;  %v260_v48 = vsub.f32 %v858_v14, %v232_v20  ;;  %v261_v50 = vmul.f32 1.442695, %v257_v33  ;;  %v1121_v15 = vld [vmem:[%s1583_s1 + $0x80] sm:$0xff]  ;;  %v1126_v16 = vld [vmem:[%s1583_s1 + $0x88] sm:$0xff] }
   0xd   :  { %888 = vpow2.f32 %v241_v36  ;;  %v36_v54 = vmax.f32 %v22_v30, %v844_v40  ;;  %v263_v55 = vmul.f32 1.442695, %v258_v38  ;;  %v37_v57 = vmax.f32 %v23_v34, %v845_v44  ;;  %v873_v25 = vld [vmem:[%s1583_s1 + $0x70] sm:$0xff]  ;;  %v1149_v31 = vld [vmem:[%s1583_s1 + $0x98] sm:$0xff]  ;;  %v1154_v32 = vld [vmem:[%s1583_s1 + $0xa0] sm:$0xff] }
   0xe   :  { %890 = vpow2.f32 %v243_v37  ;;  %v38_v58 = vmax.f32 %v24_v35, %v846_v45  ;;  %v265_v59 = vmul.f32 1.442695, %v259_v43  ;;  %v39_v60 = vmax.f32 %v35_v53, %v847_v49  ;;  %v1138_v26 = vld [vmem:[%s1583_s1 + $0x90] sm:$0xff]  ;;  %v1165_v37 = vld [vmem:[%s1583_s1 + $0xa8] sm:$0xff]  ;;  %v1183_v43 = vld [vmem:[%s1583_s1 + $0xb8] sm:$0xff] }
   0xf   :  { %892 = vpow2.f32 %v249_v41  ;;  %v40_v61 = vmax.f32 %v36_v54, %v848_v51  ;;  %v267_v62 = vmul.f32 1.442695, %v260_v48  ;;  %v41_v63 = vmax.f32 %v37_v57, %v1102_v52  ;;  %v1170_v38 = vld [vmem:[%s1583_s1 + $0xb0] sm:$0xff] }
  0x10   :  { %894 = vpow2.f32 %v251_v42  ;;  %v42_v0 = vmax.f32 %v38_v58, %v850_v56  ;;  %v43_v1 = vsub.f32 %v21_v29, %v39_v60  ;;  %v55_v3 = vsub.f32 %v843_v39, %v39_v60 }
  0x11   :  { %896 = vpow2.f32 %v253_v46  ;;  %v44_v2 = vsub.f32 %v22_v30, %v40_v61  ;;  %v45_v4 = vsub.f32 %v23_v34, %v41_v63  ;;  %v56_v6 = vsub.f32 %v844_v40, %v40_v61  ;;  %v874_v30 = vld [vmem:[%s1583_s1 + $0x78] sm:$0xff] }
  0x12   :  { %898 = vpow2.f32 %v255_v47  ;;  %v46_v5 = vsub.f32 %v24_v35, %v42_v0  ;;  %v47_v7 = vmul.f32 1.442695, %v43_v1  ;;  %v57_v9 = vsub.f32 %v845_v44, %v41_v63 }
  0x13   :  { %900 = vpow2.f32 %v261_v50  ;;  %v49_v8 = vmul.f32 1.442695, %v44_v2  ;;  %v51_v12 = vmul.f32 1.442695, %v45_v4  ;;  %v58_v14 = vsub.f32 %v846_v45, %v42_v0 }
  0x14   :  { %902 = vpow2.f32 %v263_v55  ;;  %v53_v13 = vmul.f32 1.442695, %v46_v5  ;;  %v59_v18 = vmul.f32 1.442695, %v55_v3  ;;  %v61_v19 = vmul.f32 1.442695, %v56_v6 }
  0x15   :  { %v1128_v17 = vpop.eup %884  ;;  %904 = vpow2.f32 %v265_v59  ;;  %v63_v20 = vmul.f32 1.442695, %v57_v9  ;;  %v65_v22 = vmul.f32 1.442695, %v58_v14  ;;  %v67_v23 = vsub.f32 %v847_v49, %v39_v60 }
  0x16   :  { %v1130_v21 = vpop.eup %886  ;;  %906 = vpow2.f32 %v267_v62  ;;  %v68_v24 = vsub.f32 %v848_v51, %v40_v61  ;;  %v69_v28 = vsub.f32 %v1102_v52, %v41_v63  ;;  %v70_v29 = vsub.f32 %v850_v56, %v42_v0 }
  0x17   :  { %v1140_v27 = vpop.eup %888  ;;  %908 = vpow2.f32 %v47_v7  ;;  %v608_v33 = vmax.f32 %v1111_v10, %v1121_v15  ;;  %v71_v35 = vmul.f32 1.442695, %v67_v23  ;;  %v609_v39 = vmax.f32 %v1116_v11, %v1126_v16 }
  0x18   :  { %v1158_v34 = vpop.eup %890  ;;  %910 = vpow2.f32 %v49_v8  ;;  %v1160_v36 = vmul.f32 1.442695, %v68_v24  ;;  %v1176_v41 = vmul.f32 1.442695, %v69_v28  ;;  %v1178_v42 = vmul.f32 1.442695, %v70_v29 }
  0x19   :  { %v1174_v40 = vpop.eup %892  ;;  %912 = vpow2.f32 %v51_v12  ;;  %v610_v44 = vmax.f32 %v873_v25, %v1138_v26  ;;  %v611_v47 = vmax.f32 %v874_v30, %v1149_v31  ;;  %v612_v48 = vmax.f32 %v608_v33, %v1154_v32  ;;  %v1281_v33 = vld [vmem:[%s1584_s0 + $0x88] sm:$0xff] }
  0x1a   :  { %v1186_v45 = vpop.eup %894  ;;  %v269_v46 = vadd.f32 %v1174_v40, %v1128_v17  ;;  %914 = vpow2.f32 %v53_v13  ;;  %v613_v51 = vmax.f32 %v609_v39, %v1165_v37  ;;  %1611 = vst [vmem:[#allocation7_spill] sm:$0xff] %v1281_v33  ;;  %v1296_v39 = vld [vmem:[%s1584_s0 + $0x98] sm:$0xff] }
  0x1b   :  { %v1192_v49 = vpop.eup %896  ;;  %v270_v50 = vadd.f32 %v1186_v45, %v1130_v21  ;;  %916 = vpow2.f32 %v59_v18  ;;  %v1198_v52 = vmax.f32 %v610_v44, %v1170_v38  ;;  %v615_v55 = vmax.f32 %v611_v47, %v1183_v43  ;;  %1613 = vst [vmem:[#allocation9_spill] sm:$0xff] %v1296_v39 }
  0x1c   :  { %v1200_v53 = vpop.eup %898  ;;  %v271_v54 = vadd.f32 %v1192_v49, %v1140_v27  ;;  %918 = vpow2.f32 %v61_v19  ;;  %v616_v56 = vsub.f32 %v1111_v10, %v612_v48  ;;  %v617_v59 = vsub.f32 %v1116_v11, %v613_v51  ;;  %v859_v19 = vld [vmem:[%s1584_s0 + $0x60] sm:$0xff] }
  0x1d   :  { %v1206_v57 = vpop.eup %900  ;;  %v272_v58 = vadd.f32 %v1200_v53, %v1158_v34  ;;  %920 = vpow2.f32 %v63_v20  ;;  %v618_v60 = vsub.f32 %v873_v25, %v1198_v52  ;;  %v619_v63 = vsub.f32 %v874_v30, %v615_v55  ;;  %v860_v25 = vld [vmem:[%s1584_s0 + $0x68] sm:$0xff] }
  0x1e   :  { %v1212_v61 = vpop.eup %902  ;;  %v1215_v62 = vadd.f32 %v1206_v57, %v269_v46  ;;  %922 = vpow2.f32 %v65_v22  ;;  %v620_v0 = vmul.f32 1.442695, %v616_v56  ;;  %v622_v3 = vmul.f32 1.442695, %v617_v59 }
  0x1f   :  { %v1217_v1 = vpop.eup %904  ;;  %v1220_v2 = vadd.f32 %v1212_v61, %v270_v50  ;;  %924 = vpow2.f32 %v71_v35  ;;  %v624_v4 = vmul.f32 1.442695, %v618_v60  ;;  %v626_v7 = vmul.f32 1.442695, %v619_v63  ;;  %v1286_v35 = vld [vmem:[%s1584_s0 + $0x90] sm:$0xff]  ;;  %v1316_v50 = vld [vmem:[%s1584_s0 + $0xa8] sm:$0xff] }
  0x20   :  { %v1222_v5 = vpop.eup %906  ;;  %v1225_v6 = vadd.f32 %v1217_v1, %v271_v54  ;;  %926 = vrcp.f32 %v1215_v62  ;;  %v628_v8 = vsub.f32 %v1121_v15, %v612_v48  ;;  %v629_v11 = vsub.f32 %v1126_v16, %v613_v51  ;;  %v1249_v16 = vld [vmem:[%s1584_s0 + $0x80] sm:$0xff]  ;;  %1612 = vst [vmem:[#allocation8_spill] sm:$0xff] %v1286_v35  ;;  %1615 = vst [vmem:[#allocation11_spill] sm:$0xff] %v1316_v50  ;;  %v1330_v54 = vld [vmem:[%s1584_s0 + $0xb8] sm:$0xff] }
  0x21   :  { %v1229_v9 = vpop.eup %908  ;;  %v1232_v10 = vadd.f32 %v1222_v5, %v272_v58  ;;  %928 = vrcp.f32 %v1220_v2  ;;  %v630_v12 = vsub.f32 %v1138_v26, %v1198_v52  ;;  %v631_v14 = vsub.f32 %v1149_v31, %v615_v55  ;;  %1608 = vst [vmem:[#allocation4_spill] sm:$0xff] %v1249_v16  ;;  %v1263_v26 = vld [vmem:[%s1584_s0 + $0x70] sm:$0xff]  ;;  %1617 = vst [vmem:[#allocation13_spill] sm:$0xff] %v1330_v54 }
  0x22   :  { %v1238_v13 = vpop.eup %910  ;;  %930 = vrcp.f32 %v1225_v6  ;;  %v632_v18 = vmul.f32 1.442695, %v628_v8  ;;  %v640_v15 = vsub.f32 %v1154_v32, %v612_v48  ;;  %v634_v22 = vmul.f32 1.442695, %v629_v11  ;;  %v1276_v32 = vld [vmem:[%s1584_s0 + $0x78] sm:$0xff] }
  0x23   :  { %v1251_v20 = vpop.eup %912  ;;  %932 = vrcp.f32 %v1232_v10  ;;  %v1254_v23 = vmul.f32 1.442695, %v630_v12  ;;  %v641_v24 = vsub.f32 %v1165_v37, %v613_v51  ;;  %v1268_v29 = vmul.f32 1.442695, %v631_v14  ;;  %1610 = vst [vmem:[#allocation6_spill] sm:$0xff] %v1276_v32  ;;  %v1321_v51 = vld [vmem:[%s1584_s0 + $0xb0] sm:$0xff] }
  0x24   :  { %v1265_v28 = vpop.eup %914  ;;  %934 = vpow2.f32 %v1160_v36  ;;  %v642_v30 = vsub.f32 %v1170_v38, %v1198_v52  ;;  %v643_v31 = vsub.f32 %v1183_v43, %v615_v55  ;;  %v644_v37 = vmul.f32 1.442695, %v640_v15  ;;  %v1301_v43 = vld [vmem:[%s1584_s0 + $0xa0] sm:$0xff]  ;;  %1616 = vst [vmem:[#allocation12_spill] sm:$0xff] %v1321_v51 }
  0x25   :  { %1609 = vst [vmem:[#allocation5_spill] sm:$0xff] %v1265_v28  ;;  %v1288_v36 = vpop.eup %916  ;;  %936 = vpow2.f32 %v1176_v41  ;;  %v1291_v38 = vmul.f32 1.442695, %v641_v24  ;;  %1614 = vst [vmem:[#allocation10_spill] sm:$0xff] %v1301_v43  ;;  %v416_v44 = vmax.f32 %v859_v19, %v1249_v16  ;;  %v417_v55 = vmax.f32 %v860_v25, %v1281_v33 }
  0x26   :  { %v1304_v46 = vpop.eup %918  ;;  %938 = vpow2.f32 %v1178_v42  ;;  %v79_v41 = vadd.f32 %v1288_v36, %v1229_v9  ;;  %v1309_v47 = vmul.f32 1.442695, %v642_v30  ;;  %v1311_v48 = vmul.f32 1.442695, %v643_v31 }
  0x27   :  { %v1323_v52 = vpop.eup %920  ;;  %v80_v42 = vadd.f32 %v1304_v46, %v1238_v13  ;;  %940 = vpow2.f32 %v620_v0  ;;  %v418_v56 = vmax.f32 %v1263_v26, %v1286_v35  ;;  %v419_v60 = vmax.f32 %v1276_v32, %v1296_v39 }
  0x28   :  { %v1335_v58 = vpop.eup %922  ;;  %v81_v59 = vadd.f32 %v1323_v52, %v1251_v20  ;;  %942 = vpow2.f32 %v622_v3  ;;  %v1342_v63 = vmax.f32 %v416_v44, %v1301_v43  ;;  %v1351_v11 = vmax.f32 %v417_v55, %v1316_v50 }
  0x29   :  { %1618 = vst [vmem:[#allocation14_spill] sm:$0xff] %v1335_v58  ;;  %v1344_v0 = vpop.eup %924  ;;  %v1348_v8 = vadd.f32 %v1335_v58, %v1265_v28  ;;  %944 = vpow2.f32 %v624_v4  ;;  %v1354_v12 = vmax.f32 %v418_v56, %v1321_v51  ;;  %v1360_v15 = vmax.f32 %v419_v60, %v1330_v54 }
  0x2a   :  { %1619 = vst [vmem:[#allocation15_spill] sm:$0xff] %v1342_v63  ;;  %1620 = vst [vmem:[#allocation16_spill] sm:$0xff] %v1351_v11  ;;  %v927_v3 = vpop.eup %926  ;;  %v1357_v14 = vadd.f32 %v1344_v0, %v79_v41  ;;  %946 = vpow2.f32 %v626_v7  ;;  %v424_v24 = vsub.f32 %v859_v19, %v1342_v63  ;;  %v425_v4 = vsub.f32 %v860_v25, %v1351_v11 }
  0x2b   :  { %1621 = vst [vmem:[#allocation17_spill] sm:$0xff] %v1354_v12  ;;  %1622 = vst [vmem:[#allocation18_spill] sm:$0xff] %v1360_v15  ;;  %v929_v30 = vpop.eup %928  ;;  %v281_v31 = vmul.f32 %v927_v3, %v1215_v62  ;;  %948 = vpow2.f32 %v632_v18  ;;  %v426_v44 = vsub.f32 %v1263_v26, %v1354_v12 }
  0x2c   :  { %v931_v55 = vpop.eup %930  ;;  %v282_v56 = vmul.f32 %v929_v30, %v1220_v2  ;;  %950 = vrcp.f32 %v1357_v14  ;;  %v1371_v41 = vmul.f32 1.442695, %v424_v24  ;;  %v1374_v18 = vmul.f32 1.442695, %v425_v4 }
  0x2d   :  { %v933_v19 = vpop.eup %932  ;;  %v283_v60 = vmul.f32 %v931_v55, %v1225_v6  ;;  %v285_v62 = vsub.f32 2.0, %v281_v31  ;;  %952 = vpow2.f32 %v634_v22  ;;  %v1380_v2 = vmul.f32 1.442695, %v426_v44 }
  0x2e   :  { %1623 = vst [vmem:[#allocation19_spill] sm:$0xff] %v1371_v41  ;;  %1624 = vst [vmem:[#allocation20_spill] sm:$0xff] %v1374_v18  ;;  %v1376_v25 = vpop.eup %934  ;;  %v284_v26 = vmul.f32 %v933_v19, %v1232_v10  ;;  %v286_v54 = vsub.f32 2.0, %v282_v56  ;;  %954 = vpow2.f32 %v1254_v23 }
  0x2f   :  { %1625 = vst [vmem:[#allocation21_spill] sm:$0xff] %v1380_v2  ;;  %v1382_v51 = vpop.eup %936  ;;  %v287_v24 = vsub.f32 2.0, %v283_v60  ;;  %v289_v7 = vmul.f32 %v927_v3, %v285_v62  ;;  %v1385_v50 = vadd.f32 %v1376_v25, %v80_v42  ;;  %956 = vpow2.f32 %v1268_v29 }
  0x30   :  { %1626 = vst [vmem:[#allocation22_spill] sm:$0xff] %v1382_v51  ;;  %v1388_v6 = vpop.eup %938  ;;  %v288_v22 = vsub.f32 2.0, %v284_v26  ;;  %v290_v31 = vmul.f32 %v929_v30, %v286_v54  ;;  %v1391_v10 = vadd.f32 %v1382_v51, %v81_v59  ;;  %958 = vpow2.f32 %v644_v37 }
  0x31   :  { %v1393_v23 = vpop.eup %940  ;;  %v291_v4 = vmul.f32 %v931_v55, %v287_v24  ;;  %v293_v44 = vmul.f32 %v1128_v17, %v289_v7  ;;  %v297_v3 = vmul.f32 %v1174_v40, %v289_v7  ;;  %v301_v42 = vmul.f32 %v1206_v57, %v289_v7 }
  0x32   :  { %v1398_v56 = vpop.eup %942  ;;  %v292_v29 = vmul.f32 %v933_v19, %v288_v22  ;;  %v294_v60 = vmul.f32 %v1130_v21, %v290_v31  ;;  %v298_v54 = vmul.f32 %v1186_v45, %v290_v31  ;;  %v302_v59 = vmul.f32 %v1212_v61, %v290_v31 }
  0x33   :  { %v1403_v30 = vpop.eup %944  ;;  %v295_v37 = vmul.f32 %v1140_v27, %v291_v4  ;;  %v299_v55 = vmul.f32 %v1192_v49, %v291_v4  ;;  %v303_v17 = vmul.f32 %v1217_v1, %v291_v4  ;;  %v305_v40 = vmul.f32 %v293_v44, %v293_v44 }
  0x34   :  { %v1408_v62 = vpop.eup %946  ;;  %v296_v57 = vmul.f32 %v1158_v34, %v292_v29  ;;  %v300_v7 = vmul.f32 %v1200_v53, %v292_v29  ;;  %v304_v21 = vmul.f32 %v1222_v5, %v292_v29  ;;  %v306_v45 = vmul.f32 %v294_v60, %v294_v60 }
  0x35   :  { %v1413_v19 = vpop.eup %948  ;;  %v307_v61 = vmul.f32 %v295_v37, %v295_v37  ;;  %v321_v26 = vmul.f32 %v297_v3, %v293_v44  ;;  %v322_v24 = vmul.f32 %v298_v54, %v294_v60  ;;  %v323_v27 = vmul.f32 %v299_v55, %v295_v37 }
  0x36   :  { %v1415_v22 = vpop.eup %950  ;;  %v308_v49 = vmul.f32 %v296_v57, %v296_v57  ;;  %v309_v1 = vadd.f32 %v306_v45, %v305_v40  ;;  %v324_v31 = vmul.f32 %v300_v7, %v296_v57  ;;  %v337_v4 = vmul.f32 %v301_v42, %v293_v44 }
  0x37   :  { %v1417_v43 = vpop.eup %952  ;;  %v325_v34 = vadd.f32 %v322_v24, %v321_v26  ;;  %v338_v2 = vmul.f32 %v302_v59, %v294_v60  ;;  %v339_v53 = vmul.f32 %v303_v17, %v295_v37  ;;  %v340_v18 = vmul.f32 %v304_v21, %v296_v57 }
  0x38   :  { %v1419_v5 = vpop.eup %954  ;;  %v310_v29 = vadd.f32 %v309_v1, %v307_v61  ;;  %v353_v39 = vmul.f32 %v297_v3, %v297_v3  ;;  %v354_v41 = vmul.f32 %v298_v54, %v298_v54  ;;  %v355_v35 = vmul.f32 %v299_v55, %v299_v55 }
  0x39   :  { %v1421_v12 = vpop.eup %956  ;;  %v326_v33 = vadd.f32 %v325_v34, %v323_v27  ;;  %v341_v11 = vadd.f32 %v338_v2, %v337_v4  ;;  %v356_v16 = vmul.f32 %v300_v7, %v300_v7  ;;  %v369_v40 = vmul.f32 %v301_v42, %v297_v3 }
  0x3a   :  { %v1423_v45 = vpop.eup %958  ;;  %v311_v44 = vadd.f32 %v310_v29, %v308_v49  ;;  %v357_v63 = vadd.f32 %v354_v41, %v353_v39  ;;  %v370_v26 = vmul.f32 %v302_v59, %v298_v54  ;;  %v371_v60 = vmul.f32 %v303_v17, %v299_v55 }
  0x3b   :  { %1627 = vst [vmem:[#allocation23_spill] sm:$0xff] %v1423_v45  ;;  %v327_v37 = vadd.f32 %v326_v33, %v324_v31  ;;  %v342_v57 = vadd.f32 %v341_v11, %v339_v53  ;;  %v372_v24 = vmul.f32 %v304_v21, %v300_v7  ;;  %v385_v15 = vmul.f32 %v301_v42, %v301_v42  ;;  %v318_v31 = vld [vmem:[#allocation3] sm:$0x1] }
  0x3c   :  { %v312_v61 = vrot.slane %v311_v44, 4  ;;  %v358_v1 = vadd.f32 %v357_v63, %v355_v35  ;;  %v373_v32 = vadd.f32 %v370_v26, %v369_v40  ;;  %v386_v58 = vmul.f32 %v302_v59, %v302_v59  ;;  %v334_v40 = vld [vmem:[#allocation3 + $0x1] sm:$0x1] }
  0x3d   :  { %v328_v28 = vrot.slane %v327_v37, 4  ;;  %v343_v51 = vadd.f32 %v342_v57, %v340_v18  ;;  %v387_v27 = vmul.f32 %v303_v17, %v303_v17  ;;  %v388_v2 = vmul.f32 %v304_v21, %v304_v21 }
  0x3e   :  { %v313_v4 = vadd.f32 %v312_v61, %v311_v44  ;;  %v359_v3 = vadd.f32 %v358_v1, %v356_v16  ;;  %v374_v34 = vadd.f32 %v373_v32, %v371_v60  ;;  %v389_v45 = vadd.f32 %v386_v58, %v385_v15  ;;  %v350_v1 = vld [vmem:[#allocation3 + $0x2] sm:$0x1] }
  0x3f   :  { %v329_v49 = vadd.f32 %v328_v28, %v327_v37  ;;  %v344_v39 = vrot.slane %v343_v51, 4  ;;  %v1427_v33 = vadd.f32 %v1388_v6, %v1348_v8  ;;  %960 = vrcp.f32 %v1385_v50 }
  0x40   :  { %v314_v11 = vrot.slane %v313_v4, 2  ;;  %v360_v35 = vrot.slane %v359_v3, 4  ;;  %v375_v63 = vadd.f32 %v374_v34, %v372_v24  ;;  %v390_v41 = vadd.f32 %v389_v45, %v387_v27 }
  0x41   :  { %v330_v42 = vrot.slane %v329_v49, 2  ;;  %v345_v18 = vadd.f32 %v344_v39, %v343_v51  ;;  %962 = vrcp.f32 %v1391_v10  ;;  %v91_v16 = vmul.f32 %v1415_v22, %v1357_v14 }
  0x42   :  { %v315_v32 = vadd.f32 %v314_v11, %v313_v4  ;;  %v361_v28 = vadd.f32 %v360_v35, %v359_v3  ;;  %v376_v58 = vrot.slane %v375_v63, 4  ;;  %v391_v15 = vadd.f32 %v390_v41, %v388_v2 }
  0x43   :  { %v331_v54 = vadd.f32 %v330_v42, %v329_v49  ;;  %v346_v8 = vrot.slane %v345_v18, 2  ;;  %964 = vrcp.f32 %v1427_v33  ;;  %v95_v59 = vsub.f32 2.0, %v91_v16  ;;  %v382_v42 = vld [vmem:[#allocation3 + $0x4] sm:$0x1] }
  0x44   :  { %v316_v55 = vrot.slane %v315_v32, 1  ;;  %v362_v17 = vrot.slane %v361_v28, 2  ;;  %v377_v7 = vadd.f32 %v376_v58, %v375_v63  ;;  %v392_v21 = vrot.slane %v391_v15, 4 }
  0x45   :  { %v332_v51 = vrot.slane %v331_v54, 1  ;;  %v347_v53 = vadd.f32 %v346_v8, %v345_v18  ;;  %v99_v29 = vmul.f32 %v1415_v22, %v95_v59  ;;  %966 = vpow2.f32 %v1291_v38  ;;  %v366_v38 = vld [vmem:[#allocation3 + $0x3] sm:$0x1]  ;;  %v398_v8 = vld [vmem:[#allocation3 + $0x5] sm:$0x1] }
  0x46   :  { %v317_v14 = vadd.f32 %v316_v55, %v315_v32  ;;  %v363_v45 = vadd.f32 %v362_v17, %v361_v28  ;;  %v378_v44 = vrot.slane %v377_v7, 2  ;;  %v393_v26 = vadd.f32 %v392_v21, %v391_v15 }
  0x47   :  { %v333_v60 = vadd.f32 %v332_v51, %v331_v54  ;;  %v348_v37 = vrot.slane %v347_v53, 1  ;;  %v103_v57 = vmul.f32 %v1229_v9, %v99_v29  ;;  %v107_v24 = vmul.f32 %v1288_v36, %v99_v29 }
  0x48   :  { %v319_v61 = vadd.f32 %v318_v31, %v317_v14  ;;  %v364_v27 = vrot.slane %v363_v45, 1  ;;  %v379_v2 = vadd.f32 %v378_v44, %v377_v7  ;;  %v394_v4 = vrot.slane %v393_v26, 2 }
  0x49   :  { %v961_v3 = vpop.eup %960  ;;  %v335_v22 = vadd.f32 %v334_v40, %v333_v60  ;;  %v349_v34 = vadd.f32 %v348_v37, %v347_v53  ;;  %v111_v49 = vmul.f32 %v1344_v0, %v99_v29  ;;  %v115_v39 = vmul.f32 %v103_v57, %v103_v57 }
  0x4a   :  { %320 = vst [vmem:[#allocation3] sm:$0x1] %v319_v61  ;;  %v365_v11 = vadd.f32 %v364_v27, %v363_v45  ;;  %v380_v35 = vrot.slane %v379_v2, 1  ;;  %v395_v63 = vadd.f32 %v394_v4, %v393_v26  ;;  %v92_v9 = vmul.f32 %v961_v3, %v1385_v50 }
  0x4b   :  { %v963_v41 = vpop.eup %962  ;;  %336 = vst [vmem:[#allocation3 + $0x1] sm:$0x1] %v335_v22  ;;  %v351_v36 = vadd.f32 %v350_v1, %v349_v34  ;;  %v131_v18 = vmul.f32 %v107_v24, %v103_v57  ;;  %v147_v16 = vmul.f32 %v111_v49, %v103_v57  ;;  %v163_v32 = vmul.f32 %v107_v24, %v107_v24 }
  0x4c   :  { %v367_v28 = vadd.f32 %v366_v38, %v365_v11  ;;  %v381_v58 = vadd.f32 %v380_v35, %v379_v2  ;;  %v396_v15 = vrot.slane %v395_v63, 1  ;;  %v93_v54 = vmul.f32 %v963_v41, %v1391_v10 }
  0x4d   :  { %v965_v0 = vpop.eup %964  ;;  %352 = vst [vmem:[#allocation3 + $0x2] sm:$0x1] %v351_v36  ;;  %v96_v59 = vsub.f32 2.0, %v92_v9  ;;  %v179_v55 = vmul.f32 %v111_v49, %v107_v24  ;;  %v1441_v17 = vmul.f32 %v111_v49, %v111_v49  ;;  %968 = vpow2.f32 %v1309_v47  ;;  %v1628_v24 = vld [vmem:[#allocation22_spill] sm:$0xff] }
  0x4e   :  { %368 = vst [vmem:[#allocation3 + $0x3] sm:$0x1] %v367_v28  ;;  %v383_v50 = vadd.f32 %v382_v42, %v381_v58  ;;  %v397_v7 = vadd.f32 %v396_v15, %v395_v63  ;;  %v94_v21 = vmul.f32 %v965_v0, %v1427_v33  ;;  %v97_v31 = vsub.f32 2.0, %v93_v54 }
  0x4f   :  { %v1445_v51 = vpop.eup %966  ;;  %v100_v53 = vmul.f32 %v961_v3, %v96_v59  ;;  %970 = vpow2.f32 %v1311_v48  ;;  %v652_v10 = vadd.f32 %v1413_v19, %v1393_v23  ;;  %v653_v29 = vadd.f32 %v1417_v43, %v1398_v56 }
  0x50   :  { %384 = vst [vmem:[#allocation3 + $0x4] sm:$0x1] %v383_v50  ;;  %v399_v47 = vadd.f32 %v398_v8, %v397_v7  ;;  %v98_v14 = vsub.f32 2.0, %v94_v21  ;;  %v101_v40 = vmul.f32 %v963_v41, %v97_v31  ;;  %v1454_v33 = vadd.f32 %v1419_v5, %v1403_v30 }
  0x51   :  { %v104_v45 = vmul.f32 %v1238_v13, %v100_v53  ;;  %v108_v44 = vmul.f32 %v1304_v46, %v100_v53  ;;  %v112_v48 = vmul.f32 %v1376_v25, %v100_v53  ;;  %v655_v26 = vadd.f32 %v1421_v12, %v1408_v62  ;;  %v1629_v13 = vld [vmem:[#allocation5_spill] sm:$0xff]  ;;  %v1630_v46 = vld [vmem:[#allocation14_spill] sm:$0xff] }
  0x52   :  { %400 = vst [vmem:[#allocation3 + $0x5] sm:$0x1] %v399_v47  ;;  %v102_v60 = vmul.f32 %v965_v0, %v98_v14  ;;  %v105_v37 = vmul.f32 %v1251_v20, %v101_v40  ;;  %v109_v57 = vmul.f32 %v1323_v52, %v101_v40  ;;  %v113_v61 = vmul.f32 %v1628_v24, %v101_v40 }
  0x53   :  { %v116_v1 = vmul.f32 %v104_v45, %v104_v45  ;;  %v132_v27 = vmul.f32 %v108_v44, %v104_v45  ;;  %v148_v2 = vmul.f32 %v112_v48, %v104_v45  ;;  %v164_v4 = vmul.f32 %v108_v44, %v108_v44 }
  0x54   :  { %v106_v3 = vmul.f32 %v1629_v13, %v102_v60  ;;  %v110_v22 = vmul.f32 %v1630_v46, %v102_v60  ;;  %v114_v25 = vmul.f32 %v1388_v6, %v102_v60  ;;  %v117_v34 = vmul.f32 %v105_v37, %v105_v37 }
  0x55   :  { %v119_v38 = vadd.f32 %v116_v1, %v115_v39  ;;  %v133_v49 = vmul.f32 %v109_v57, %v105_v37  ;;  %v135_v11 = vadd.f32 %v132_v27, %v131_v18  ;;  %v149_v35 = vmul.f32 %v113_v61, %v105_v37  ;;  %v1631_v1 = vld [vmem:[#allocation23_spill] sm:$0xff] }
  0x56   :  { %v118_v20 = vmul.f32 %v106_v3, %v106_v3  ;;  %v134_v63 = vmul.f32 %v110_v22, %v106_v3  ;;  %v150_v52 = vmul.f32 %v114_v25, %v106_v3  ;;  %v151_v9 = vadd.f32 %v148_v2, %v147_v16 }
  0x57   :  { %v1467_v41 = vpop.eup %968  ;;  %v120_v36 = vadd.f32 %v119_v38, %v117_v34  ;;  %v136_v42 = vadd.f32 %v135_v11, %v133_v49  ;;  %v165_v28 = vmul.f32 %v109_v57, %v109_v57  ;;  %v166_v58 = vmul.f32 %v110_v22, %v110_v22  ;;  %v1632_v49 = vld [vmem:[#allocation6_spill] sm:$0xff] }
  0x58   :  { %v152_v15 = vadd.f32 %v151_v9, %v149_v35  ;;  %v167_v54 = vadd.f32 %v164_v4, %v163_v32  ;;  %v180_v0 = vmul.f32 %v112_v48, %v108_v44  ;;  %v181_v8 = vmul.f32 %v113_v61, %v109_v57  ;;  %v1633_v11 = vld [vmem:[#allocation18_spill] sm:$0xff] }
  0x59   :  { %v1469_v6 = vpop.eup %970  ;;  %v814_v39 = vld [vmem:[#allocation3] sm:$0x3f]  ;;  %v121_v59 = vadd.f32 %v120_v36, %v118_v20  ;;  %v137_v18 = vadd.f32 %v136_v42, %v134_v63  ;;  %v182_v50 = vmul.f32 %v114_v25, %v110_v22  ;;  %v196_v7 = vmul.f32 %v112_v48, %v112_v48 }
  0x5a   :  { %v816_v21 = vsel %vm790_vm0, %v814_v39, 0.0  ;;  %v153_v16 = vadd.f32 %v152_v15, %v150_v52  ;;  %v168_v31 = vadd.f32 %v167_v54, %v165_v28  ;;  %v183_v53 = vadd.f32 %v180_v0, %v179_v55  ;;  %v1636_v28 = vld [vmem:[#allocation4_spill] sm:$0xff] }
  0x5b   :  { %817 = vadd.xlane.f32.xlu1 %v816_v21  ;;  %v122_v47 = vrot.slane %v121_v59, 4  ;;  %v138_v14 = vrot.slane %v137_v18, 4  ;;  %v197_v40 = vmul.f32 %v113_v61, %v113_v61  ;;  %v198_v45 = vmul.f32 %v114_v25, %v114_v25  ;;  %v128_v15 = vld [vmem:[#allocation2] sm:$0x1]  ;;  %v144_v54 = vld [vmem:[#allocation2 + $0x1] sm:$0x1] }
  0x5c   :  { %v154_v32 = vrot.slane %v153_v16, 4  ;;  %v169_v44 = vadd.f32 %v168_v31, %v166_v58  ;;  %v184_v60 = vadd.f32 %v183_v53, %v181_v8  ;;  %v199_v37 = vadd.f32 %v196_v7, %v1441_v17  ;;  %v160_v7 = vld [vmem:[#allocation2 + $0x2] sm:$0x1] }
  0x5d   :  { %v123_v57 = vadd.f32 %v122_v47, %v121_v59  ;;  %v139_v24 = vadd.f32 %v138_v14, %v137_v18  ;;  %v1474_v27 = vadd.f32 %v1631_v1, %v652_v10  ;;  %v1477_v48 = vadd.f32 %v1445_v51, %v653_v29  ;;  %v1637_v21 = vld [vmem:[#allocation16_spill] sm:$0xff] }
  0x5e   :  { %v155_v2 = vadd.f32 %v154_v32, %v153_v16  ;;  %v170_v55 = vrot.slane %v169_v44, 4  ;;  %v185_v4 = vadd.f32 %v184_v60, %v182_v50  ;;  %v200_v13 = vadd.f32 %v199_v37, %v197_v40  ;;  %v1638_v16 = vld [vmem:[#allocation7_spill] sm:$0xff]  ;;  %v1639_v60 = vld [vmem:[#allocation17_spill] sm:$0xff]  ;;  %v1640_v37 = vld [vmem:[#allocation8_spill] sm:$0xff] }
  0x5f   :  { %v124_v3 = vrot.slane %v123_v57, 2  ;;  %v140_v61 = vrot.slane %v139_v24, 2  ;;  %v1481_v46 = vadd.f32 %v1467_v41, %v1454_v33  ;;  %v1484_v17 = vadd.f32 %v1469_v6, %v655_v26  ;;  %v1635_v26 = vld [vmem:[#allocation15_spill] sm:$0xff] }
  0x60   :  { %v156_v22 = vrot.slane %v155_v2, 2  ;;  %v171_v25 = vadd.f32 %v170_v55, %v169_v44  ;;  %v186_v10 = vrot.slane %v185_v4, 4  ;;  %v201_v34 = vadd.f32 %v200_v13, %v198_v45  ;;  %v176_v44 = vld [vmem:[#allocation2 + $0x3] sm:$0x1]  ;;  %v192_v13 = vld [vmem:[#allocation2 + $0x4] sm:$0x1] }
  0x61   :  { %v125_v38 = vadd.f32 %v124_v3, %v123_v57  ;;  %v141_v29 = vadd.f32 %v140_v61, %v139_v24  ;;  %972 = vrcp.f32 %v1474_v27  ;;  %v1634_v35 = vsub.f32 %v1632_v49, %v1633_v11  ;;  %v1641_v3 = vld [vmem:[#allocation19_spill] sm:$0xff]  ;;  %v1642_v61 = vld [vmem:[#allocation9_spill] sm:$0xff]  ;;  %v1643_v49 = vld [vmem:[#allocation20_spill] sm:$0xff] }
  0x62   :  { %v157_v63 = vadd.f32 %v156_v22, %v155_v2  ;;  %v172_v52 = vrot.slane %v171_v25, 2  ;;  %v187_v9 = vadd.f32 %v186_v10, %v185_v4  ;;  %v202_v33 = vrot.slane %v201_v34, 4 }
  0x63   :  { %v434_v20 = vmul.f32 1.442695, %v1634_v35  ;;  %v126_v36 = vrot.slane %v125_v38, 1  ;;  %v142_v42 = vrot.slane %v141_v29, 1  ;;  %974 = vrcp.f32 %v1477_v48 }
  0x64   :  { %v436_v58 = vsub.f32 %v1636_v28, %v1635_v26  ;;  %v158_v0 = vrot.slane %v157_v63, 1  ;;  %v173_v8 = vadd.f32 %v172_v52, %v171_v25  ;;  %v188_v39 = vrot.slane %v187_v9, 2  ;;  %v1644_v52 = vld [vmem:[#allocation21_spill] sm:$0xff] }
  0x65   :  { %v203_v59 = vadd.f32 %v202_v33, %v201_v34  ;;  %v127_v18 = vadd.f32 %v126_v36, %v125_v38  ;;  %v143_v50 = vadd.f32 %v142_v42, %v141_v29  ;;  %976 = vrcp.f32 %v1481_v46  ;;  %v1645_v36 = vld [vmem:[#allocation10_spill] sm:$0xff] }
  0x66   :  { %v437_v31 = vsub.f32 %v1638_v16, %v1637_v21  ;;  %v159_v53 = vadd.f32 %v158_v0, %v157_v63  ;;  %v174_v47 = vrot.slane %v173_v8, 1  ;;  %v189_v14 = vadd.f32 %v188_v39, %v187_v9  ;;  %v208_v63 = vld [vmem:[#allocation2 + $0x5] sm:$0x1]  ;;  %v1646_v0 = vld [vmem:[#allocation11_spill] sm:$0xff]  ;;  %v1648_v16 = vld [vmem:[#allocation13_spill] sm:$0xff] }
  0x67   :  { %v204_v40 = vrot.slane %v203_v59, 2  ;;  %v129_v45 = vadd.f32 %v128_v15, %v127_v18  ;;  %v145_v32 = vadd.f32 %v144_v54, %v143_v50  ;;  %978 = vrcp.f32 %v1484_v17  ;;  %v1647_v39 = vld [vmem:[#allocation12_spill] sm:$0xff] }
  0x68   :  { %v438_v57 = vsub.f32 %v1640_v37, %v1639_v60  ;;  %v161_v24 = vadd.f32 %v160_v7, %v159_v53  ;;  %v175_v2 = vadd.f32 %v174_v47, %v173_v8  ;;  %v190_v55 = vrot.slane %v189_v14, 1 }
  0x69   :  { %v205_v4 = vadd.f32 %v204_v40, %v203_v59  ;;  %130 = vst [vmem:[#allocation2] sm:$0x1] %v129_v45  ;;  %146 = vst [vmem:[#allocation2 + $0x1] sm:$0x1] %v145_v32  ;;  %980 = vpow2.f32 %v1641_v3  ;;  %v439_v22 = vsub.f32 %v1642_v61, %v1633_v11  ;;  %v440_v25 = vmul.f32 1.442695, %v436_v58 }
  0x6a   :  { %v442_v10 = vmul.f32 1.442695, %v437_v31  ;;  %162 = vst [vmem:[#allocation2 + $0x2] sm:$0x1] %v161_v24  ;;  %v177_v34 = vadd.f32 %v176_v44, %v175_v2  ;;  %v191_v38 = vadd.f32 %v190_v55, %v189_v14  ;;  %982 = vpow2.f32 %v1643_v49 }
  0x6b   :  { %v206_v29 = vrot.slane %v205_v4, 1  ;;  %v973_v35 = vpop.eup %972  ;;  %984 = vpow2.f32 %v1644_v52  ;;  %v444_v9 = vmul.f32 1.442695, %v438_v57  ;;  %v446_v33 = vmul.f32 1.442695, %v439_v22 }
  0x6c   :  { %v448_v42 = vsub.f32 %v1645_v36, %v1635_v26  ;;  %178 = vst [vmem:[#allocation2 + $0x3] sm:$0x1] %v177_v34  ;;  %v193_v28 = vadd.f32 %v192_v13, %v191_v38  ;;  %v664_v58 = vmul.f32 %v973_v35, %v1474_v27  ;;  %986 = vpow2.f32 %v434_v20 }
  0x6d   :  { %v207_v15 = vadd.f32 %v206_v29, %v205_v4  ;;  %v975_v54 = vpop.eup %974  ;;  %988 = vpow2.f32 %v440_v25  ;;  %v449_v8 = vsub.f32 %v1646_v0, %v1637_v21  ;;  %v450_v59 = vsub.f32 %v1647_v39, %v1639_v60 }
  0x6e   :  { %194 = vst [vmem:[#allocation2 + $0x4] sm:$0x1] %v193_v28  ;;  %v665_v50 = vmul.f32 %v975_v54, %v1477_v48  ;;  %v668_v7 = vsub.f32 2.0, %v664_v58  ;;  %990 = vpow2.f32 %v442_v10  ;;  %v451_v27 = vsub.f32 %v1648_v16, %v1633_v11 }
  0x6f   :  { %v209_v18 = vadd.f32 %v208_v63, %v207_v15  ;;  %v977_v26 = vpop.eup %976  ;;  %992 = vpow2.f32 %v444_v9  ;;  %v452_v20 = vmul.f32 1.442695, %v448_v42  ;;  %v454_v31 = vmul.f32 1.442695, %v449_v8 }
  0x70   :  { %v666_v53 = vmul.f32 %v977_v26, %v1481_v46  ;;  %v669_v21 = vsub.f32 2.0, %v665_v50  ;;  %v672_v47 = vmul.f32 %v973_v35, %v668_v7  ;;  %994 = vpow2.f32 %v446_v33 }
  0x71   :  { %210 = vst [vmem:[#allocation2 + $0x5] sm:$0x1] %v209_v18  ;;  %v979_v14 = vpop.eup %978  ;;  %996 = vpow2.f32 %v452_v20  ;;  %v1515_v40 = vmul.f32 1.442695, %v450_v59  ;;  %v1523_v46 = vmul.f32 1.442695, %v451_v27 }
  0x72   :  { %v667_v48 = vmul.f32 %v979_v14, %v1484_v17  ;;  %v670_v45 = vsub.f32 2.0, %v666_v53  ;;  %v673_v32 = vmul.f32 %v975_v54, %v669_v21  ;;  %v676_v44 = vmul.f32 %v1393_v23, %v672_v47 }
  0x73   :  { %v1519_v60 = vpop.eup %980  ;;  %v680_v11 = vmul.f32 %v1413_v19, %v672_v47  ;;  %v684_v37 = vmul.f32 %v1631_v1, %v672_v47  ;;  %998 = vpow2.f32 %v454_v31 }
  0x74   :  { %v1525_v57 = vpop.eup %982  ;;  %v671_v24 = vsub.f32 2.0, %v667_v48  ;;  %v674_v2 = vmul.f32 %v977_v26, %v670_v45  ;;  %v677_v55 = vmul.f32 %v1398_v56, %v673_v32  ;;  %v681_v17 = vmul.f32 %v1417_v43, %v673_v32 }
  0x75   :  { %v1529_v4 = vpop.eup %984  ;;  %v685_v23 = vmul.f32 %v1445_v51, %v673_v32  ;;  %v688_v13 = vmul.f32 %v676_v44, %v676_v44  ;;  %v705_v3 = vmul.f32 %v680_v11, %v676_v44  ;;  %v721_v19 = vmul.f32 %v684_v37, %v676_v44 }
  0x76   :  { %v1532_v61 = vpop.eup %986  ;;  %v675_v1 = vmul.f32 %v979_v14, %v671_v24  ;;  %v678_v22 = vmul.f32 %v1403_v30, %v674_v2  ;;  %v682_v25 = vmul.f32 %v1419_v5, %v674_v2  ;;  %v686_v10 = vmul.f32 %v1467_v41, %v674_v2 }
  0x77   :  { %v1537_v34 = vpop.eup %988  ;;  %v689_v43 = vmul.f32 %v677_v55, %v677_v55  ;;  %v706_v38 = vmul.f32 %v681_v17, %v677_v55  ;;  %v722_v29 = vmul.f32 %v685_v23, %v677_v55  ;;  %v737_v49 = vmul.f32 %v680_v11, %v680_v11 }
  0x78   :  { %v788_v56 = vld [vmem:[#allocation2] sm:$0x3f]  ;;  %v1539_v51 = vpop.eup %990  ;;  %v679_v63 = vmul.f32 %v1408_v62, %v675_v1  ;;  %v683_v52 = vmul.f32 %v1421_v12, %v675_v1  ;;  %v687_v30 = vmul.f32 %v1469_v6, %v675_v1  ;;  %v690_v41 = vmul.f32 %v678_v22, %v678_v22 }
  0x79   :  { %v791_v35 = vsel %vm790_vm0, %v788_v56, 0.0  ;;  %v1545_v5 = vpop.eup %992  ;;  %v692_v9 = vadd.f32 %v689_v43, %v688_v13  ;;  %v707_v33 = vmul.f32 %v682_v25, %v678_v22  ;;  %v709_v36 = vadd.f32 %v706_v38, %v705_v3 }
  0x7a   :  { %792 = vadd.xlane.f32.xlu0 %v791_v35  ;;  %v1547_v42 = vpop.eup %994  ;;  %v691_v28 = vmul.f32 %v679_v63, %v679_v63  ;;  %v708_v15 = vmul.f32 %v683_v52, %v679_v63  ;;  %v723_v58 = vmul.f32 %v686_v10, %v678_v22  ;;  %v724_v54 = vmul.f32 %v687_v30, %v679_v63 }
  0x7b   :  { %v1549_v0 = vpop.eup %996  ;;  %v693_v62 = vadd.f32 %v692_v9, %v690_v41  ;;  %v710_v8 = vadd.f32 %v709_v36, %v707_v33  ;;  %v725_v12 = vadd.f32 %v722_v29, %v721_v19  ;;  %v738_v39 = vmul.f32 %v681_v17, %v681_v17 }
  0x7c   :  { %v739_v6 = vmul.f32 %v682_v25, %v682_v25  ;;  %v740_v59 = vmul.f32 %v683_v52, %v683_v52  ;;  %v753_v18 = vmul.f32 %v684_v37, %v680_v11  ;;  %v754_v50 = vmul.f32 %v685_v23, %v681_v17 }
  0x7d   :  { %v1551_v7 = vpop.eup %998  ;;  %v694_v26 = vadd.f32 %v693_v62, %v691_v28  ;;  %v711_v16 = vadd.f32 %v710_v8, %v708_v15  ;;  %v726_v27 = vadd.f32 %v725_v12, %v723_v58  ;;  %v741_v20 = vadd.f32 %v738_v39, %v737_v49  ;;  %v702_v28 = vld [vmem:[#allocation3 + $0x8] sm:$0x1]  ;;  %v718_v15 = vld [vmem:[#allocation3 + $0x9] sm:$0x1] }
  0x7e   :  { %v755_v31 = vmul.f32 %v686_v10, %v682_v25  ;;  %v756_v53 = vmul.f32 %v687_v30, %v683_v52  ;;  %v757_v21 = vadd.f32 %v754_v50, %v753_v18  ;;  %v769_v47 = vmul.f32 %v684_v37, %v684_v37 }
  0x7f   :  { %v695_v14 = vrot.slane %v694_v26, 4  ;;  %v712_v48 = vrot.slane %v711_v16, 4  ;;  %v727_v45 = vadd.f32 %v726_v27, %v724_v54  ;;  %v742_v32 = vadd.f32 %v741_v20, %v739_v6 }
  0x80   :  { %v758_v44 = vadd.f32 %v757_v21, %v755_v31  ;;  %v770_v24 = vmul.f32 %v685_v23, %v685_v23  ;;  %v771_v2 = vmul.f32 %v686_v10, %v686_v10  ;;  %v772_v55 = vmul.f32 %v687_v30, %v687_v30  ;;  %v750_v21 = vld [vmem:[#allocation3 + $0xb] sm:$0x1] }
  0x81   :  { %v696_v11 = vadd.f32 %v695_v14, %v694_v26  ;;  %v713_v17 = vadd.f32 %v712_v48, %v711_v16  ;;  %v728_v13 = vrot.slane %v727_v45, 4  ;;  %v743_v3 = vadd.f32 %v742_v32, %v740_v59  ;;  %v734_v59 = vld [vmem:[#allocation3 + $0xa] sm:$0x1]  ;;  %v766_v32 = vld [vmem:[#allocation3 + $0xc] sm:$0x1] }
  0x82   :  { %v759_v19 = vadd.f32 %v758_v44, %v756_v53  ;;  %v773_v1 = vadd.f32 %v770_v24, %v769_v47  ;;  %1000 = vpow2.f32 %v1515_v40  ;;  %v460_v22 = vadd.f32 %v1537_v34, %v1519_v60 }
  0x83   :  { %v697_v37 = vrot.slane %v696_v11, 2  ;;  %v714_v25 = vrot.slane %v713_v17, 2  ;;  %v729_v56 = vadd.f32 %v728_v13, %v727_v45  ;;  %v744_v43 = vrot.slane %v743_v3, 4 }
  0x84   :  { %v760_v38 = vrot.slane %v759_v19, 4  ;;  %v774_v29 = vadd.f32 %v773_v1, %v771_v2  ;;  %1002 = vpow2.f32 %v1523_v46  ;;  %v461_v23 = vadd.f32 %v1539_v51, %v1525_v57 }
  0x85   :  { %v698_v10 = vadd.f32 %v697_v37, %v696_v11  ;;  %v715_v49 = vadd.f32 %v714_v25, %v713_v17  ;;  %v730_v35 = vrot.slane %v729_v56, 2  ;;  %v745_v63 = vadd.f32 %v744_v43, %v743_v3 }
  0x86   :  { %v761_v52 = vadd.f32 %v760_v38, %v759_v19  ;;  %v775_v40 = vadd.f32 %v774_v29, %v772_v55  ;;  %v462_v30 = vadd.f32 %v1545_v5, %v1529_v4  ;;  %v464_v54 = vadd.f32 %v1549_v0, %v460_v22  ;;  %v782_v19 = vld [vmem:[#allocation3 + $0xd] sm:$0x1] }
  0x87   :  { %v699_v41 = vrot.slane %v698_v10, 1  ;;  %v716_v9 = vrot.slane %v715_v49, 1  ;;  %v731_v33 = vadd.f32 %v730_v35, %v729_v56  ;;  %v746_v36 = vrot.slane %v745_v63, 2 }
  0x88   :  { %v762_v58 = vrot.slane %v761_v52, 2  ;;  %v776_v46 = vrot.slane %v775_v40, 4  ;;  %v465_v62 = vadd.f32 %v1551_v7, %v461_v23  ;;  %v463_v26 = vadd.f32 %v1547_v42, %v1532_v61 }
  0x89   :  { %v700_v8 = vadd.f32 %v699_v41, %v698_v10  ;;  %v717_v12 = vadd.f32 %v716_v9, %v715_v49  ;;  %v732_v39 = vrot.slane %v731_v33, 1  ;;  %v747_v6 = vadd.f32 %v746_v36, %v745_v63 }
  0x8a   :  { %v763_v18 = vadd.f32 %v762_v58, %v761_v52  ;;  %v777_v50 = vadd.f32 %v776_v46, %v775_v40  ;;  %1004 = vrcp.f32 %v464_v54 }
  0x8b   :  { %v703_v16 = vadd.f32 %v702_v28, %v700_v8  ;;  %v719_v27 = vadd.f32 %v718_v15, %v717_v12  ;;  %v733_v20 = vadd.f32 %v732_v39, %v731_v33  ;;  %v748_v31 = vrot.slane %v747_v6, 1 }
  0x8c   :  { %v1001_v53 = vpop.eup %1000  ;;  %v764_v47 = vrot.slane %v763_v18, 1  ;;  %v778_v14 = vrot.slane %v777_v50, 2  ;;  %1006 = vrcp.f32 %v465_v62 }
  0x8d   :  { %704 = vst [vmem:[#allocation3 + $0x8] sm:$0x1] %v703_v16  ;;  %720 = vst [vmem:[#allocation3 + $0x9] sm:$0x1] %v719_v27  ;;  %v735_v48 = vadd.f32 %v734_v59, %v733_v20  ;;  %v749_v45 = vadd.f32 %v748_v31, %v747_v6  ;;  %v466_v44 = vadd.f32 %v1001_v53, %v462_v30 }
  0x8e   :  { %v1003_v24 = vpop.eup %1002  ;;  %v765_v2 = vadd.f32 %v764_v47, %v763_v18  ;;  %v779_v55 = vadd.f32 %v778_v14, %v777_v50 }
  0x8f   :  { %736 = vst [vmem:[#allocation3 + $0xa] sm:$0x1] %v735_v48  ;;  %v751_v11 = vadd.f32 %v750_v21, %v749_v45  ;;  %v467_v17 = vadd.f32 %v1003_v24, %v463_v26  ;;  %1008 = vrcp.f32 %v466_v44 }
  0x90   :  { %v767_v13 = vadd.f32 %v766_v32, %v765_v2  ;;  %v780_v3 = vrot.slane %v779_v55, 1 }
  0x91   :  { %752 = vst [vmem:[#allocation3 + $0xb] sm:$0x1] %v751_v11  ;;  %1010 = vrcp.f32 %v467_v17 }
  0x92   :  { %768 = vst [vmem:[#allocation3 + $0xc] sm:$0x1] %v767_v13  ;;  %v781_v1 = vadd.f32 %v780_v3, %v779_v55 }
  0x94   :  { %v1005_v22 = vpop.eup %1004  ;;  %v783_v37 = vadd.f32 %v782_v19, %v781_v1 }
  0x95   :  { %v472_v25 = vmul.f32 %v1005_v22, %v464_v54 }
  0x96   :  { %v1007_v56 = vpop.eup %1006  ;;  %784 = vst [vmem:[#allocation3 + $0xd] sm:$0x1] %v783_v37 }
  0x97   :  { %v473_v43 = vmul.f32 %v1007_v56, %v465_v62  ;;  %v476_v38 = vsub.f32 2.0, %v472_v25 }
  0x99   :  { %v1009_v29 = vpop.eup %1008  ;;  %v477_v23 = vsub.f32 2.0, %v473_v43  ;;  %v480_v10 = vmul.f32 %v1005_v22, %v476_v38 }
  0x9a   :  { %v474_v49 = vmul.f32 %v1009_v29, %v466_v44 }
  0x9b   :  { %v1011_v35 = vpop.eup %1010  ;;  %v481_v63 = vmul.f32 %v1007_v56, %v477_v23  ;;  %v484_v52 = vmul.f32 %v1519_v60, %v480_v10  ;;  %v488_v40 = vmul.f32 %v1537_v34, %v480_v10  ;;  %v492_v30 = vmul.f32 %v1549_v0, %v480_v10 }
  0x9c   :  { %v475_v41 = vmul.f32 %v1011_v35, %v467_v17  ;;  %v478_v9 = vsub.f32 2.0, %v474_v49 }
  0x9d   :  { %v815_v33 = vld [vmem:[#allocation3 + $0x8] sm:$0x3f]  ;;  %v485_v36 = vmul.f32 %v1525_v57, %v481_v63  ;;  %v489_v28 = vmul.f32 %v1539_v51, %v481_v63  ;;  %v493_v15 = vmul.f32 %v1551_v7, %v481_v63  ;;  %v496_v58 = vmul.f32 %v484_v52, %v484_v52 }
  0x9e   :  { %v819_v46 = vsel %vm790_vm0, %v815_v33, 0.0  ;;  %v479_v54 = vsub.f32 2.0, %v475_v41  ;;  %v482_v62 = vmul.f32 %v1009_v29, %v478_v9  ;;  %v513_v8 = vmul.f32 %v488_v40, %v484_v52 }
  0x9f   :  { %820 = vadd.xlane.f32.xlu1 %v819_v46  ;;  %v497_v60 = vmul.f32 %v485_v36, %v485_v36  ;;  %v514_v34 = vmul.f32 %v489_v28, %v485_v36  ;;  %v529_v12 = vmul.f32 %v492_v30, %v484_v52  ;;  %v530_v0 = vmul.f32 %v493_v15, %v485_v36 }
  0xa0   :  { %v483_v39 = vmul.f32 %v1011_v35, %v479_v54  ;;  %v486_v6 = vmul.f32 %v1529_v4, %v482_v62  ;;  %v490_v57 = vmul.f32 %v1545_v5, %v482_v62  ;;  %v494_v59 = vmul.f32 %v1001_v53, %v482_v62 }
  0xa1   :  { %v500_v51 = vadd.f32 %v497_v60, %v496_v58  ;;  %v517_v18 = vadd.f32 %v514_v34, %v513_v8  ;;  %v533_v7 = vadd.f32 %v530_v0, %v529_v12  ;;  %v545_v50 = vmul.f32 %v488_v40, %v488_v40  ;;  %v510_v12 = vld [vmem:[#allocation2 + $0x8] sm:$0x1] }
  0xa2   :  { %v487_v26 = vmul.f32 %v1532_v61, %v483_v39  ;;  %v491_v16 = vmul.f32 %v1547_v42, %v483_v39  ;;  %v495_v27 = vmul.f32 %v1003_v24, %v483_v39  ;;  %v498_v20 = vmul.f32 %v486_v6, %v486_v6 }
  0xa3   :  { %v515_v31 = vmul.f32 %v490_v57, %v486_v6  ;;  %v531_v21 = vmul.f32 %v494_v59, %v486_v6  ;;  %v546_v47 = vmul.f32 %v489_v28, %v489_v28  ;;  %v547_v14 = vmul.f32 %v490_v57, %v490_v57 }
  0xa4   :  { %v499_v48 = vmul.f32 %v487_v26, %v487_v26  ;;  %v501_v45 = vadd.f32 %v500_v51, %v498_v20  ;;  %v516_v4 = vmul.f32 %v491_v16, %v487_v26  ;;  %v532_v32 = vmul.f32 %v495_v27, %v487_v26  ;;  %v542_v51 = vld [vmem:[#allocation2 + $0xa] sm:$0x1]  ;;  %v558_v20 = vld [vmem:[#allocation2 + $0xb] sm:$0x1] }
  0xa5   :  { %v518_v5 = vadd.f32 %v517_v18, %v515_v31  ;;  %v534_v53 = vadd.f32 %v533_v7, %v531_v21  ;;  %v548_v44 = vmul.f32 %v491_v16, %v491_v16  ;;  %v549_v2 = vadd.f32 %v546_v47, %v545_v50 }
  0xa6   :  { %v502_v55 = vadd.f32 %v501_v45, %v499_v48  ;;  %v561_v11 = vmul.f32 %v492_v30, %v488_v40  ;;  %v562_v17 = vmul.f32 %v493_v15, %v489_v28  ;;  %v563_v61 = vmul.f32 %v494_v59, %v490_v57 }
  0xa7   :  { %v519_v13 = vadd.f32 %v518_v5, %v516_v4  ;;  %v535_v42 = vadd.f32 %v534_v53, %v532_v32  ;;  %v550_v24 = vadd.f32 %v549_v2, %v547_v14  ;;  %v564_v3 = vmul.f32 %v495_v27, %v491_v16  ;;  %v574_v5 = vld [vmem:[#allocation2 + $0xc] sm:$0x1]  ;;  %v590_v2 = vld [vmem:[#allocation2 + $0xd] sm:$0x1] }
  0xa8   :  { %v503_v19 = vrot.slane %v502_v55, 4  ;;  %v565_v1 = vadd.f32 %v562_v17, %v561_v11  ;;  %v577_v22 = vmul.f32 %v492_v30, %v492_v30  ;;  %v578_v37 = vmul.f32 %v493_v15, %v493_v15 }
  0xa9   :  { %v520_v25 = vrot.slane %v519_v13, 4  ;;  %v536_v56 = vrot.slane %v535_v42, 4  ;;  %v551_v43 = vadd.f32 %v550_v24, %v548_v44  ;;  %v579_v38 = vmul.f32 %v494_v59, %v494_v59  ;;  %v526_v59 = vld [vmem:[#allocation2 + $0x9] sm:$0x1] }
  0xaa   :  { %v504_v29 = vadd.f32 %v503_v19, %v502_v55  ;;  %v566_v23 = vadd.f32 %v565_v1, %v563_v61  ;;  %v580_v10 = vmul.f32 %v495_v27, %v495_v27  ;;  %v581_v49 = vadd.f32 %v578_v37, %v577_v22 }
  0xab   :  { %v521_v35 = vadd.f32 %v520_v25, %v519_v13  ;;  %v537_v63 = vadd.f32 %v536_v56, %v535_v42  ;;  %v552_v52 = vrot.slane %v551_v43, 4  ;;  %v799_v42 = vlaneseq }
  0xac   :  { %v505_v40 = vrot.slane %v504_v29, 2  ;;  %v567_v41 = vadd.f32 %v566_v23, %v564_v3  ;;  %v582_v9 = vadd.f32 %v581_v49, %v579_v38 }
  0xad   :  { %v522_v33 = vrot.slane %v521_v35, 2  ;;  %v538_v36 = vrot.slane %v537_v63, 2  ;;  %v553_v28 = vadd.f32 %v552_v52, %v551_v43  ;;  %v800_v24 = vand.u32 127, %v799_v42 }
  0xae   :  { %v506_v58 = vadd.f32 %v505_v40, %v504_v29  ;;  %v568_v30 = vrot.slane %v567_v41, 4  ;;  %v583_v15 = vadd.f32 %v582_v9, %v580_v10  ;;  %v802_v3 = vshrl.u32 %v799_v42, 7 }
  0xaf   :  { %v523_v46 = vadd.f32 %v522_v33, %v521_v35  ;;  %v539_v54 = vadd.f32 %v538_v36, %v537_v63  ;;  %v554_v62 = vrot.slane %v553_v28, 2 }
  0xb0   :  { %v507_v8 = vrot.slane %v506_v58, 1  ;;  %v569_v60 = vadd.f32 %v568_v30, %v567_v41  ;;  %v584_v34 = vrot.slane %v583_v15, 4  ;;  %v803_v1 = vsub.s32 %v800_v24, %v802_v3 }
  0xb1   :  { %v524_v0 = vrot.slane %v523_v46, 1  ;;  %v540_v39 = vrot.slane %v539_v54, 1  ;;  %v555_v6 = vadd.f32 %v554_v62, %v553_v28 }
  0xb2   :  { %v508_v57 = vadd.f32 %v507_v8, %v506_v58  ;;  %v570_v18 = vrot.slane %v569_v60, 2  ;;  %v585_v7 = vadd.f32 %v584_v34, %v583_v15 }
  0xb3   :  { %v525_v50 = vadd.f32 %v524_v0, %v523_v46  ;;  %v541_v26 = vadd.f32 %v540_v39, %v539_v54  ;;  %v556_v16 = vrot.slane %v555_v6, 1 }
  0xb4   :  { %v511_v27 = vadd.f32 %v510_v12, %v508_v57  ;;  %v571_v31 = vadd.f32 %v570_v18, %v569_v60  ;;  %v586_v21 = vrot.slane %v585_v7, 2 }
  0xb5   :  { %v527_v47 = vadd.f32 %v526_v59, %v525_v50  ;;  %v543_v14 = vadd.f32 %v542_v51, %v541_v26  ;;  %v557_v48 = vadd.f32 %v556_v16, %v555_v6 }
  0xb6   :  { %512 = vst [vmem:[#allocation2 + $0x8] sm:$0x1] %v511_v27  ;;  %v572_v45 = vrot.slane %v571_v31, 1  ;;  %v587_v4 = vadd.f32 %v586_v21, %v585_v7 }
  0xb7   :  { %528 = vst [vmem:[#allocation2 + $0x9] sm:$0x1] %v527_v47  ;;  %544 = vst [vmem:[#allocation2 + $0xa] sm:$0x1] %v543_v14  ;;  %v559_v32 = vadd.f32 %v558_v20, %v557_v48 }
  0xb8   :  { %v573_v53 = vadd.f32 %v572_v45, %v571_v31  ;;  %v588_v44 = vrot.slane %v587_v4, 1 }
  0xb9   :  { %560 = vst [vmem:[#allocation2 + $0xb] sm:$0x1] %v559_v32 }
  0xba   :  { %v575_v55 = vadd.f32 %v574_v5, %v573_v53  ;;  %v589_v11 = vadd.f32 %v588_v44, %v587_v4 }
  0xbc   :  { %576 = vst [vmem:[#allocation2 + $0xc] sm:$0x1] %v575_v55  ;;  %v591_v17 = vadd.f32 %v590_v2, %v589_v11 }
  0xbe   :  { %592 = vst [vmem:[#allocation2 + $0xd] sm:$0x1] %v591_v17 }
  0xc5   :  { %v789_v61 = vld [vmem:[#allocation2 + $0x8] sm:$0x3f] }
  0xc6   :  { %v794_v13 = vsel %vm790_vm0, %v789_v61, 0.0 }
  0xc7   :  { %795 = vadd.xlane.f32.xlu0 %v794_v13 }
  0xe8   :  { %v818_v19 = vpop.xlane.xlu1 %817 }
  0xe9   :  { %v827_v37 = vrot.slane %v818_v19, %v803_v1 }
 0x107   :  { %v793_v43 = vpop.xlane.xlu0 %792 }
 0x108   :  { %v804_v29 = vrot.slane %v793_v43, %v803_v1 }
 0x12c   :  { %v821_v22 = vpop.xlane.xlu1 %820 }
 0x12d   :  { %v831_v25 = vrot.slane %v821_v22, %v803_v1 }
 0x12f   :  { %v832_v56 = vsel %vm809_vm1, %v831_v25, %v827_v37 }
 0x130   :  { %834 = vst.msk [vmem:[%s1585_s3] sm:$0x3] %vm812_vm2, %v832_v56 }
 0x154   :  { %v796_v38 = vpop.xlane.xlu0 %795 }
 0x155   :  { %v808_v23 = vrot.slane %v796_v38, %v803_v1 }
 0x157   :  { %v810_v10 = vsel %vm809_vm1, %v808_v23, %v804_v29 }
 0x158   :  { %813 = vst.msk [vmem:[%s1586_s2] sm:$0x3] %vm812_vm2, %v810_v10 }

</bundles_post_ra>
